<compile_context>
chip_gen: v7x
topology: tpu7x:2x2x1
jax: 0.10.0
libtpu: 0.0.40
codegen_flags: <defaults>
</compile_context>

<pallas_src>
import math
import jax
import jax.numpy as jnp
from jax.experimental import pallas as pl
from jax.experimental.pallas import tpu as pltpu


def self_att_core_kernel(
    xt_ref, fcq_ref, fck_ref, att_ref, patt_ref, state_ref,
    w_att_ref, b_att_ref, w_lang_ref, b_lang_ref,
    h2att_w_ref, h2att_b_ref, alpha_w_ref, alpha_b_ref,
    out_ref,
    h_att_scr, c_att_scr, att_h_scr, m_scr, s_scr, acc_scr,
):
    R = fcq_ref.shape[1]
    cd = w_att_ref.dtype                      # MXU operand dtype (f32 or bf16)
    l_idx = pl.program_id(1)
    n_l = pl.num_programs(1)

    def gate_activations(gates):
        # sigmoid on i/f/o lanes, tanh on the g lanes — full-tile EUP ops plus a lane
        # mask instead of four narrow masked sub-slices.
        lane = jax.lax.broadcasted_iota(jnp.int32, gates.shape, 1)
        is_g = (lane >= 2 * R) & (lane < 3 * R)
        return jnp.where(is_g, jnp.tanh(gates), jax.nn.sigmoid(gates))

    @pl.when(l_idx == 0)
    def _init():
        sp = state_ref[...]                   # [TB, 4R] = [h0 | h1 | c0 | c1]
        h0 = sp[:, 0:R]
        h1 = sp[:, R:2 * R]                   # prev_h = state[0][-1]
        c0 = sp[:, 2 * R:3 * R]

        # scaled dot-product self-attention across the batch (q = k = v = fc_feats)
        fc_q = fcq_ref[...].astype(cd)        # this row block (queries)
        fc_k = fck_ref[...].astype(cd)        # full batch (keys / values)
        scores = jax.lax.dot_general(
            fc_q, fc_k, (((1,), (1,)), ((), ())),
            preferred_element_type=jnp.float32) * (1.0 / math.sqrt(R))      # [TB, B]
        scores = scores - jnp.max(scores, axis=-1, keepdims=True)
        e = jnp.exp(scores)
        p_attn = e * pl.reciprocal(jnp.sum(e, axis=-1, keepdims=True))
        # TODO(synk): dropout on p_attn skipped (module evaluated in eval mode -> identity)
        fc_att = jnp.dot(p_attn.astype(cd), fc_k,
                         preferred_element_type=jnp.float32)                # [TB, R]

        # att_lstm: single fused gate matmul over [prev_h, fc_att, xt, h0]
        x_in = jnp.concatenate([h1, fc_att, xt_ref[...], h0], axis=1)       # [TB, 3R+E]
        gates = (jnp.dot(x_in.astype(cd), w_att_ref[...],
                         preferred_element_type=jnp.float32) + b_att_ref[...])
        act = gate_activations(gates)
        i_g = act[:, 0:R]
        f_g = act[:, R:2 * R]
        g_g = act[:, 2 * R:3 * R]
        o_g = act[:, 3 * R:4 * R]
        c_att = f_g * c0 + i_g * g_g
        h_att = o_g * jnp.tanh(c_att)

        h_att_scr[...] = h_att
        c_att_scr[...] = c_att
        att_h_scr[...] = (jnp.dot(h_att.astype(cd), h2att_w_ref[...],
                                  preferred_element_type=jnp.float32) + h2att_b_ref[...])
        m_scr[...] = jnp.full(m_scr.shape, -jnp.inf, jnp.float32)
        s_scr[...] = jnp.zeros(s_scr.shape, jnp.float32)
        acc_scr[...] = jnp.zeros(acc_scr.shape, jnp.float32)

    # ---- additive attention over this L tile (online-softmax accumulation) ----
    att_h = att_h_scr[...]                                     # [TB, H]
    dots = jnp.tanh(patt_ref[...] + att_h[:, None, :])         # [TB, TL, H]
    # alpha_net: H-reduction (bias cancels in the softmax but kept for faithfulness)
    logits = (jnp.sum(dots * alpha_w_ref[...][None, :, :], axis=-1)
              + alpha_b_ref[...])                              # [TB, TL]
    m_prev = m_scr[...]
    m_new = jnp.maximum(m_prev, jnp.max(logits, axis=-1, keepdims=True))
    corr = jnp.exp(m_prev - m_new)
    p = jnp.exp(logits - m_new)                                # [TB, TL]
    s_scr[...] = corr * s_scr[...] + jnp.sum(p, axis=-1, keepdims=True)
    pv = jnp.einsum('bql,blr->bqr', p[:, None, :].astype(cd),
                    att_ref[...].astype(cd),
                    preferred_element_type=jnp.float32)[:, 0, :]   # [TB, R] on the MXU
    acc_scr[...] = corr * acc_scr[...] + pv
    m_scr[...] = m_new

    @pl.when(l_idx == n_l - 1)
    def _finish():
        sp = state_ref[...]
        h1 = sp[:, R:2 * R]
        c1 = sp[:, 3 * R:4 * R]
        h_att = h_att_scr[...]
        c_att = c_att_scr[...]
        att_res = acc_scr[...] * pl.reciprocal(s_scr[...])               # [TB, R]

        # lang_lstm: single fused gate matmul over [att_res, h_att, h1]
        x_l = jnp.concatenate([att_res, h_att, h1], axis=1)              # [TB, 3R]
        gates2 = (jnp.dot(x_l.astype(cd), w_lang_ref[...],
                          preferred_element_type=jnp.float32) + b_lang_ref[...])
        act2 = gate_activations(gates2)
        i2 = act2[:, 0:R]
        f2 = act2[:, R:2 * R]
        g2 = act2[:, 2 * R:3 * R]
        o2 = act2[:, 3 * R:4 * R]
        c_lang = f2 * c1 + i2 * g2
        h_lang = o2 * jnp.tanh(c_lang)

        # TODO(synk): output dropout skipped (eval mode -> identity)
        out_ref[...] = jnp.concatenate([h_att, h_lang, c_att, c_lang], axis=1)


def prepare_params(raw_params, mxu_dtype=jnp.float32):
    """One-time prep: fuse LSTM input/hidden weights into single stacked matrices (one
    MXU dot per cell) and cast the large weight matrices to the MXU dtype (bf16 on
    v6e/v7x). Biases and small attention vectors stay f32 (v5e-safe elementwise path)."""
    (w_ih_att, w_hh_att, b_att, w_ih_lang, w_hh_lang, b_lang,
     h2att_w, h2att_b, alpha_w, alpha_b) = raw_params
    w_att = jnp.concatenate([w_ih_att, w_hh_att], axis=0).astype(mxu_dtype)    # [3R+E, 4R]
    w_lang = jnp.concatenate([w_ih_lang, w_hh_lang], axis=0).astype(mxu_dtype)  # [3R, 4R]
    return (w_att, b_att.astype(jnp.float32), w_lang, b_lang.astype(jnp.float32),
            h2att_w.astype(mxu_dtype), h2att_b.astype(jnp.float32),
            alpha_w.astype(jnp.float32), alpha_b.astype(jnp.float32))


def self_att_core(xt, fc_feats, att_feats, p_att_feats, state, prep_params,
                  block_b=8, block_l=16):
    (w_att, b_att, w_lang, b_lang, h2att_w, h2att_b, alpha_w, alpha_b) = prep_params
    state_h, state_c = state
    B, R = fc_feats.shape
    L = att_feats.shape[1]
    E = xt.shape[1]
    H = p_att_feats.shape[2]

    TB = block_b if (B % block_b == 0 and block_b % 8 == 0) else B
    TL = block_l if (L % block_l == 0 and block_l % 8 == 0) else L
    nb, nl = B // TB, L // TL

    # lane-dense packed state slab [h0 | h1 | c0 | c1]; aliased to the packed output
    state_packed = jnp.concatenate(
        [state_h[0], state_h[1], state_c[0], state_c[1]], axis=1).astype(jnp.float32)

    in_specs = [
        pl.BlockSpec((TB, E), lambda b, l: (b, 0)),            # xt
        pl.BlockSpec((TB, R), lambda b, l: (b, 0)),            # fc row block (queries)
        pl.BlockSpec((B, R), lambda b, l: (0, 0)),             # fc full batch (keys/values)
        pl.BlockSpec((TB, TL, R), lambda b, l: (b, l, 0)),     # att_feats tile
        pl.BlockSpec((TB, TL, H), lambda b, l: (b, l, 0)),     # p_att_feats tile
        pl.BlockSpec((TB, 4 * R), lambda b, l: (b, 0)),        # packed state
        pl.BlockSpec(w_att.shape, lambda b, l: (0, 0)),        # weights: constant block,
        pl.BlockSpec(b_att.shape, lambda b, l: (0, 0)),        # DMA'd once / resident
        pl.BlockSpec(w_lang.shape, lambda b, l: (0, 0)),
        pl.BlockSpec(b_lang.shape, lambda b, l: (0, 0)),
        pl.BlockSpec(h2att_w.shape, lambda b, l: (0, 0)),
        pl.BlockSpec(h2att_b.shape, lambda b, l: (0, 0)),
        pl.BlockSpec(alpha_w.shape, lambda b, l: (0, 0)),
        pl.BlockSpec(alpha_b.shape, lambda b, l: (0, 0)),
    ]
    out_spec = pl.BlockSpec((TB, 4 * R), lambda b, l: (b, 0))
    scratch = [
        pltpu.VMEM((TB, R), jnp.float32),   # h_att
        pltpu.VMEM((TB, R), jnp.float32),   # c_att
        pltpu.VMEM((TB, H), jnp.float32),   # h2att(h_att)
        pltpu.VMEM((TB, 1), jnp.float32),   # running max
        pltpu.VMEM((TB, 1), jnp.float32),   # running sum
        pltpu.VMEM((TB, R), jnp.float32),   # running weighted value accumulator
    ]

    new_state = pl.pallas_call(
        self_att_core_kernel,
        out_shape=jax.ShapeDtypeStruct((B, 4 * R), jnp.float32),
        grid=(nb, nl),
        in_specs=in_specs,
        out_specs=out_spec,
        scratch_shapes=scratch,
        input_output_aliases={5: 0},        # packed state is updated in place (no extra HBM buf)
        compiler_params=pltpu.CompilerParams(
            dimension_semantics=("parallel", "arbitrary")),
    )(xt, fc_feats, fc_feats, att_feats, p_att_feats, state_packed,
      w_att, b_att, w_lang, b_lang, h2att_w, h2att_b, alpha_w, alpha_b)

    h_att = new_state[:, 0:R]
    h_lang = new_state[:, R:2 * R]
    c_att = new_state[:, 2 * R:3 * R]
    c_lang = new_state[:, 3 * R:4 * R]
    output = h_lang                         # dropout(h_lang) == identity in eval mode
    return output, (jnp.stack([h_att, h_lang]), jnp.stack([c_att, c_lang]))


# ----------------------------- pure-JAX reference -----------------------------
def _lstm_cell_ref(x, h, c, w_ih_t, w_hh_t, b):
    R = h.shape[1]
    gates = x @ w_ih_t + h @ w_hh_t + b
    i = jax.nn.sigmoid(gates[:, 0:R])
    f = jax.nn.sigmoid(gates[:, R:2 * R])
    g = jnp.tanh(gates[:, 2 * R:3 * R])
    o = jax.nn.sigmoid(gates[:, 3 * R:4 * R])
    c_new = f * c + i * g
    return o * jnp.tanh(c_new), c_new


def self_att_core_ref(xt, fc_feats, att_feats, p_att_feats, state, params):
    (w_ih_att, w_hh_att, b_att, w_ih_lang, w_hh_lang, b_lang,
     h2att_w, h2att_b, alpha_w, alpha_b) = params
    state_h, state_c = state
    R = fc_feats.shape[1]
    prev_h = state_h[-1]
    scores = (fc_feats @ fc_feats.T) / math.sqrt(R)
    p_attn = jax.nn.softmax(scores, axis=-1)
    fc = p_attn @ fc_feats
    x_att = jnp.concatenate([prev_h, fc, xt], axis=1)
    h_att, c_att = _lstm_cell_ref(x_att, state_h[0], state_c[0], w_ih_att, w_hh_att, b_att)
    att_h = h_att @ h2att_w + h2att_b
    dot = jnp.tanh(p_att_feats + att_h[:, None, :])
    logits = jnp.sum(dot * alpha_w[None, :, :], axis=-1) + alpha_b
    weight = jax.nn.softmax(logits, axis=1)
    att_res = jnp.einsum('bl,bld->bd', weight, att_feats)
    x_lang = jnp.concatenate([att_res, h_att], axis=1)
    h_lang, c_lang = _lstm_cell_ref(x_lang, state_h[1], state_c[1], w_ih_lang, w_hh_lang, b_lang)
    return h_lang, (jnp.stack([h_att, h_lang]), jnp.stack([c_att, c_lang]))


# ----------------------------- parameter init -----------------------------
def init_params(key, E, R, H):
    def lin(k, shape, fan_in):
        bound = 1.0 / math.sqrt(fan_in)
        return jax.random.uniform(k, shape, jnp.float32, -bound, bound)

    ks = jax.random.split(key, 14)
    # LSTMCell weights stored pre-transposed: [in_dim, 4R] / [R, 4R]; biases combined.
    w_ih_att = lin(ks[0], (E + 2 * R, 4 * R), R)
    w_hh_att = lin(ks[1], (R, 4 * R), R)
    b_att = lin(ks[2], (1, 4 * R), R) + lin(ks[3], (1, 4 * R), R)   # b_ih + b_hh
    w_ih_lang = lin(ks[4], (2 * R, 4 * R), R)
    w_hh_lang = lin(ks[5], (R, 4 * R), R)
    b_lang = lin(ks[6], (1, 4 * R), R) + lin(ks[7], (1, 4 * R), R)
    # Attention module: h2att Linear(R -> H), alpha_net Linear(H -> 1)
    h2att_w = lin(ks[8], (R, H), R)
    h2att_b = lin(ks[9], (1, H), R)
    alpha_w = lin(ks[10], (1, H), H)
    alpha_b = lin(ks[11], (1, 1), H)
    return (w_ih_att, w_hh_att, b_att, w_ih_lang, w_hh_lang, b_lang,
            h2att_w, h2att_b, alpha_w, alpha_b)


if __name__ == "__main__":
    # batch, input_encoding, rnn_size, att_hid_size, att locations
    B, E, R, H, L = 16, 32, 32, 32, 32   # grid = (2 batch blocks, 2 L tiles)

    key = jax.random.PRNGKey(0)
    k_xt, k_fc, k_af, k_pf, k_h, k_c, k_p = jax.random.split(key, 7)
    xt = jax.random.normal(k_xt, (B, E), jnp.float32)
    fc_feats = jax.random.normal(k_fc, (B, R), jnp.float32)
    att_feats = jax.random.normal(k_af, (B, L, R), jnp.float32)
    p_att_feats = jax.random.normal(k_pf, (B, L, H), jnp.float32)
    state = (jax.random.normal(k_h, (2, B, R), jnp.float32),
             jax.random.normal(k_c, (2, B, R), jnp.float32))
    raw_params = init_params(k_p, E, R, H)

    fwd = jax.jit(self_att_core)

    # --- exact f32 path ---
    prep_f32 = prepare_params(raw_params, jnp.float32)
    out, (new_h, new_c) = fwd(xt, fc_feats, att_feats, p_att_feats, state, prep_f32)
    jax.block_until_ready((out, new_h, new_c))

    ref_out, (ref_h, ref_c) = self_att_core_ref(xt, fc_feats, att_feats, p_att_feats,
                                                state, raw_params)
    assert jnp.allclose(out, ref_out, atol=1e-5), "output mismatch (f32)"
    assert jnp.allclose(new_h, ref_h, atol=1e-5), "h state mismatch (f32)"
    assert jnp.allclose(new_c, ref_c, atol=1e-5), "c state mismatch (f32)"

    # --- bf16-MXU path (v6e/v7x-friendly); elementwise math stays f32 ---
    prep_bf16 = prepare_params(raw_params, jnp.bfloat16)
    out_b, (new_h_b, new_c_b) = fwd(xt, fc_feats, att_feats, p_att_feats, state, prep_bf16)
    jax.block_until_ready((out_b, new_h_b, new_c_b))
    assert jnp.allclose(out_b, ref_out, atol=1e-1), "output mismatch (bf16 path)"

    print("KERNEL_OK")
</pallas_src>

<mosaic_0001>
module attributes {stable_mosaic.version = 11 : i64} {
  func.func @self_att_core_kernel(%arg0: i32, %arg1: i32, %arg2: memref<8x32xf32, #tpu.memory_space<vmem>>, %arg3: memref<8x32xf32, #tpu.memory_space<vmem>>, %arg4: memref<16x32xf32, #tpu.memory_space<vmem>>, %arg5: memref<8x16x32xf32, #tpu.memory_space<vmem>>, %arg6: memref<8x16x32xf32, #tpu.memory_space<vmem>>, %arg7: memref<8x128xf32, #tpu.memory_space<vmem>>, %arg8: memref<128x128xf32, #tpu.memory_space<vmem>>, %arg9: memref<1x128xf32, #tpu.memory_space<vmem>>, %arg10: memref<96x128xf32, #tpu.memory_space<vmem>>, %arg11: memref<1x128xf32, #tpu.memory_space<vmem>>, %arg12: memref<32x32xf32, #tpu.memory_space<vmem>>, %arg13: memref<1x32xf32, #tpu.memory_space<vmem>>, %arg14: memref<1x32xf32, #tpu.memory_space<vmem>>, %arg15: memref<1x1xf32, #tpu.memory_space<vmem>>, %arg16: memref<8x128xf32, #tpu.memory_space<vmem>>, %arg17: memref<8x32xf32, #tpu.memory_space<vmem>>, %arg18: memref<8x32xf32, #tpu.memory_space<vmem>>, %arg19: memref<8x32xf32, #tpu.memory_space<vmem>>, %arg20: memref<8x1xf32, #tpu.memory_space<vmem>>, %arg21: memref<8x1xf32, #tpu.memory_space<vmem>>, %arg22: memref<8x32xf32, #tpu.memory_space<vmem>>) attributes {dimension_semantics = [#tpu.dimension_semantics<parallel>, #tpu.dimension_semantics<arbitrary>], iteration_bounds = array<i64: 2, 2>, scalar_prefetch = 0 : i64, scratch_operands = 6 : i64, tpu.core_type = #tpu.core_type<tc>, window_params = [{transform_indices = @transform_0, window_bounds = array<i64: 8, 32>}, {transform_indices = @transform_1, window_bounds = array<i64: 8, 32>}, {pipeline_mode = #tpu.pipeline_mode<synchronous>, transform_indices = @transform_2, window_bounds = array<i64: 16, 32>}, {transform_indices = @transform_3, window_bounds = array<i64: 8, 16, 32>}, {transform_indices = @transform_4, window_bounds = array<i64: 8, 16, 32>}, {transform_indices = @transform_5, window_bounds = array<i64: 8, 128>}, {pipeline_mode = #tpu.pipeline_mode<synchronous>, transform_indices = @transform_6, window_bounds = array<i64: 128, 128>}, {pipeline_mode = #tpu.pipeline_mode<synchronous>, transform_indices = @transform_7, window_bounds = array<i64: 1, 128>}, {pipeline_mode = #tpu.pipeline_mode<synchronous>, transform_indices = @transform_8, window_bounds = array<i64: 96, 128>}, {pipeline_mode = #tpu.pipeline_mode<synchronous>, transform_indices = @transform_9, window_bounds = array<i64: 1, 128>}, {pipeline_mode = #tpu.pipeline_mode<synchronous>, transform_indices = @transform_10, window_bounds = array<i64: 32, 32>}, {pipeline_mode = #tpu.pipeline_mode<synchronous>, transform_indices = @transform_11, window_bounds = array<i64: 1, 32>}, {pipeline_mode = #tpu.pipeline_mode<synchronous>, transform_indices = @transform_12, window_bounds = array<i64: 1, 32>}, {pipeline_mode = #tpu.pipeline_mode<synchronous>, transform_indices = @transform_13, window_bounds = array<i64: 1, 1>}, {transform_indices = @transform_14, window_bounds = array<i64: 8, 128>}]} {
    %c0_i32 = arith.constant 0 : i32
    %0 = arith.cmpi eq, %arg1, %c0_i32 : i32
    %1 = arith.extui %0 : i1 to i32
    %c0_i32_0 = arith.constant 0 : i32
    %2 = arith.cmpi ne, %1, %c0_i32_0 : i32
    scf.if %2 {
      %c0_28 = arith.constant 0 : index
      %c0_29 = arith.constant 0 : index
      %45 = vector.load %arg7[%c0_28, %c0_29] : memref<8x128xf32, #tpu.memory_space<vmem>>, vector<8x128xf32>
      %46 = vector.extract_strided_slice %45 {offsets = [0, 0], sizes = [8, 32], strides = [1, 1]} : vector<8x128xf32> to vector<8x32xf32>
      %47 = vector.extract_strided_slice %45 {offsets = [0, 32], sizes = [8, 32], strides = [1, 1]} : vector<8x128xf32> to vector<8x32xf32>
      %48 = vector.extract_strided_slice %45 {offsets = [0, 64], sizes = [8, 32], strides = [1, 1]} : vector<8x128xf32> to vector<8x32xf32>
      %c0_30 = arith.constant 0 : index
      %c0_31 = arith.constant 0 : index
      %49 = vector.load %arg3[%c0_30, %c0_31] : memref<8x32xf32, #tpu.memory_space<vmem>>, vector<8x32xf32>
      %c0_32 = arith.constant 0 : index
      %c0_33 = arith.constant 0 : index
      %50 = vector.load %arg4[%c0_32, %c0_33] : memref<16x32xf32, #tpu.memory_space<vmem>>, vector<16x32xf32>
      %cst_34 = arith.constant dense<0.000000e+00> : vector<8x16xf32>
      %51 = tpu.matmul %49, %50, %cst_34 {dimension_numbers = #tpu.dot_dimension_numbers<[1], [1], [0], [0], [0, 0, 1, 0], [], []>} : vector<8x32xf32>, vector<16x32xf32>, vector<8x16xf32> -> vector<8x16xf32>
      %cst_35 = arith.constant 0.176776692 : f32
      %52 = vector.broadcast %cst_35 : f32 to vector<8x16xf32>
      %53 = arith.mulf %51, %52 : vector<8x16xf32>
      %cst_36 = arith.constant dense<0xFF800000> : vector<8xf32>
      %54 = vector.multi_reduction <maximumf>, %53, %cst_36 [1] : vector<8x16xf32> to vector<8xf32>
      %55 = vector.shape_cast %54 : vector<8xf32> to vector<8x1xf32>
      %56 = vector.broadcast %55 : vector<8x1xf32> to vector<8x16xf32>
      %57 = arith.subf %53, %56 : vector<8x16xf32>
      %58 = math.exp %57 : vector<8x16xf32>
      %cst_37 = arith.constant dense<0.000000e+00> : vector<8xf32>
      %59 = vector.multi_reduction <add>, %58, %cst_37 [1] : vector<8x16xf32> to vector<8xf32>
      %60 = vector.shape_cast %59 : vector<8xf32> to vector<8x1xf32>
      %61 = tpu.reciprocal %60 : vector<8x1xf32> -> vector<8x1xf32>
      %62 = vector.broadcast %61 : vector<8x1xf32> to vector<8x16xf32>
      %63 = arith.mulf %58, %62 : vector<8x16xf32>
      %cst_38 = arith.constant dense<0.000000e+00> : vector<8x32xf32>
      %64 = tpu.matmul %63, %50, %cst_38 {dimension_numbers = #tpu.dot_dimension_numbers<[1], [0], [0], [1], [0, 0, 1, 1], [], []>} : vector<8x16xf32>, vector<16x32xf32>, vector<8x32xf32> -> vector<8x32xf32>
      %c0_39 = arith.constant 0 : index
      %c0_40 = arith.constant 0 : index
      %65 = vector.load %arg2[%c0_39, %c0_40] : memref<8x32xf32, #tpu.memory_space<vmem>>, vector<8x32xf32>
      %66 = tpu.concatenate %47, %64, %65, %46 in 1 : vector<8x32xf32>, vector<8x32xf32>, vector<8x32xf32>, vector<8x32xf32> -> vector<8x128xf32>
      %c0_41 = arith.constant 0 : index
      %c0_42 = arith.constant 0 : index
      %67 = vector.load %arg8[%c0_41, %c0_42] : memref<128x128xf32, #tpu.memory_space<vmem>>, vector<128x128xf32>
      %cst_43 = arith.constant dense<0.000000e+00> : vector<8x128xf32>
      %68 = tpu.matmul %66, %67, %cst_43 {dimension_numbers = #tpu.dot_dimension_numbers<[1], [0], [0], [1], [0, 0, 1, 1], [], []>} : vector<8x128xf32>, vector<128x128xf32>, vector<8x128xf32> -> vector<8x128xf32>
      %c0_44 = arith.constant 0 : index
      %c0_45 = arith.constant 0 : index
      %69 = vector.load %arg9[%c0_44, %c0_45] : memref<1x128xf32, #tpu.memory_space<vmem>>, vector<1x128xf32>
      %70 = vector.broadcast %69 : vector<1x128xf32> to vector<8x128xf32>
      %71 = arith.addf %68, %70 : vector<8x128xf32>
      %72 = tpu.iota {dimensions = array<i32: 1>} : vector<8x128xi32>
      %c64_i32 = arith.constant 64 : i32
      %73 = vector.broadcast %c64_i32 : i32 to vector<8x128xi32>
      %74 = arith.cmpi sge, %72, %73 : vector<8x128xi32>
      %c96_i32 = arith.constant 96 : i32
      %75 = vector.broadcast %c96_i32 : i32 to vector<8x128xi32>
      %76 = arith.cmpi slt, %72, %75 : vector<8x128xi32>
      %77 = arith.andi %74, %76 : vector<8x128xi1>
      %78 = math.tanh %71 : vector<8x128xf32>
      %79 = arith.negf %71 : vector<8x128xf32>
      %80 = math.exp %79 : vector<8x128xf32>
      %cst_46 = arith.constant 1.000000e+00 : f32
      %81 = vector.broadcast %cst_46 : f32 to vector<8x128xf32>
      %82 = arith.addf %81, %80 : vector<8x128xf32>
      %83 = arith.divf %81, %82 : vector<8x128xf32>
      %84 = arith.select %77, %78, %83 : vector<8x128xi1>, vector<8x128xf32>
      %85 = vector.extract_strided_slice %84 {offsets = [0, 0], sizes = [8, 32], strides = [1, 1]} : vector<8x128xf32> to vector<8x32xf32>
      %86 = vector.extract_strided_slice %84 {offsets = [0, 32], sizes = [8, 32], strides = [1, 1]} : vector<8x128xf32> to vector<8x32xf32>
      %87 = vector.extract_strided_slice %84 {offsets = [0, 64], sizes = [8, 32], strides = [1, 1]} : vector<8x128xf32> to vector<8x32xf32>
      %88 = vector.extract_strided_slice %84 {offsets = [0, 96], sizes = [8, 32], strides = [1, 1]} : vector<8x128xf32> to vector<8x32xf32>
      %89 = arith.mulf %86, %48 : vector<8x32xf32>
      %90 = arith.mulf %85, %87 : vector<8x32xf32>
      %91 = arith.addf %89, %90 : vector<8x32xf32>
      %92 = math.tanh %91 : vector<8x32xf32>
      %93 = arith.mulf %88, %92 : vector<8x32xf32>
      %c0_47 = arith.constant 0 : index
      %c0_48 = arith.constant 0 : index
      %94 = vector.load %arg17[%c0_47, %c0_48] : memref<8x32xf32, #tpu.memory_space<vmem>>, vector<8x32xf32>
      tpu.vector_store %arg17[%c0_47, %c0_48], %93 {strides = array<i32>} : memref<8x32xf32, #tpu.memory_space<vmem>>, vector<8x32xf32>,
      %c0_49 = arith.constant 0 : index
      %c0_50 = arith.constant 0 : index
      %95 = vector.load %arg18[%c0_49, %c0_50] : memref<8x32xf32, #tpu.memory_space<vmem>>, vector<8x32xf32>
      tpu.vector_store %arg18[%c0_49, %c0_50], %91 {strides = array<i32>} : memref<8x32xf32, #tpu.memory_space<vmem>>, vector<8x32xf32>,
      %c0_51 = arith.constant 0 : index
      %c0_52 = arith.constant 0 : index
      %96 = vector.load %arg12[%c0_51, %c0_52] : memref<32x32xf32, #tpu.memory_space<vmem>>, vector<32x32xf32>
      %cst_53 = arith.constant dense<0.000000e+00> : vector<8x32xf32>
      %97 = tpu.matmul %93, %96, %cst_53 {dimension_numbers = #tpu.dot_dimension_numbers<[1], [0], [0], [1], [0, 0, 1, 1], [], []>} : vector<8x32xf32>, vector<32x32xf32>, vector<8x32xf32> -> vector<8x32xf32>
      %c0_54 = arith.constant 0 : index
      %c0_55 = arith.constant 0 : index
      %98 = vector.load %arg13[%c0_54, %c0_55] : memref<1x32xf32, #tpu.memory_space<vmem>>, vector<1x32xf32>
      %99 = vector.broadcast %98 : vector<1x32xf32> to vector<8x32xf32>
      %100 = arith.addf %97, %99 : vector<8x32xf32>
      %c0_56 = arith.constant 0 : index
      %c0_57 = arith.constant 0 : index
      %101 = vector.load %arg19[%c0_56, %c0_57] : memref<8x32xf32, #tpu.memory_space<vmem>>, vector<8x32xf32>
      tpu.vector_store %arg19[%c0_56, %c0_57], %100 {strides = array<i32>} : memref<8x32xf32, #tpu.memory_space<vmem>>, vector<8x32xf32>,
      %cst_58 = arith.constant 0xFF800000 : f32
      %102 = vector.broadcast %cst_58 : f32 to vector<8x1xf32>
      %c0_59 = arith.constant 0 : index
      %c0_60 = arith.constant 0 : index
      %103 = vector.load %arg20[%c0_59, %c0_60] : memref<8x1xf32, #tpu.memory_space<vmem>>, vector<8x1xf32>
      tpu.vector_store %arg20[%c0_59, %c0_60], %102 {strides = array<i32>} : memref<8x1xf32, #tpu.memory_space<vmem>>, vector<8x1xf32>,
      %cst_61 = arith.constant 0.000000e+00 : f32
      %104 = vector.broadcast %cst_61 : f32 to vector<8x1xf32>
      %c0_62 = arith.constant 0 : index
      %c0_63 = arith.constant 0 : index
      %105 = vector.load %arg21[%c0_62, %c0_63] : memref<8x1xf32, #tpu.memory_space<vmem>>, vector<8x1xf32>
      tpu.vector_store %arg21[%c0_62, %c0_63], %104 {strides = array<i32>} : memref<8x1xf32, #tpu.memory_space<vmem>>, vector<8x1xf32>,
      %cst_64 = arith.constant 0.000000e+00 : f32
      %106 = vector.broadcast %cst_64 : f32 to vector<8x32xf32>
      %c0_65 = arith.constant 0 : index
      %c0_66 = arith.constant 0 : index
      %107 = vector.load %arg22[%c0_65, %c0_66] : memref<8x32xf32, #tpu.memory_space<vmem>>, vector<8x32xf32>
      tpu.vector_store %arg22[%c0_65, %c0_66], %106 {strides = array<i32>} : memref<8x32xf32, #tpu.memory_space<vmem>>, vector<8x32xf32>,
    } else {
    }
    %c0 = arith.constant 0 : index
    %c0_1 = arith.constant 0 : index
    %3 = vector.load %arg19[%c0, %c0_1] : memref<8x32xf32, #tpu.memory_space<vmem>>, vector<8x32xf32>
    %c0_2 = arith.constant 0 : index
    %c0_3 = arith.constant 0 : index
    %c0_4 = arith.constant 0 : index
    %4 = vector.load %arg6[%c0_2, %c0_3, %c0_4] : memref<8x16x32xf32, #tpu.memory_space<vmem>>, vector<8x16x32xf32>
    %5 = vector.shape_cast %3 : vector<8x32xf32> to vector<8x1x32xf32>
    %6 = vector.broadcast %5 : vector<8x1x32xf32> to vector<8x16x32xf32>
    %7 = arith.addf %4, %6 : vector<8x16x32xf32>
    %8 = math.tanh %7 : vector<8x16x32xf32>
    %c0_5 = arith.constant 0 : index
    %c0_6 = arith.constant 0 : index
    %9 = vector.load %arg14[%c0_5, %c0_6] : memref<1x32xf32, #tpu.memory_space<vmem>>, vector<1x32xf32>
    %10 = vector.shape_cast %9 : vector<1x32xf32> to vector<1x1x32xf32>
    %11 = vector.broadcast %10 : vector<1x1x32xf32> to vector<8x16x32xf32>
    %12 = arith.mulf %8, %11 : vector<8x16x32xf32>
    %cst = arith.constant dense<0.000000e+00> : vector<8x16xf32>
    %13 = vector.multi_reduction <add>, %12, %cst [2] : vector<8x16x32xf32> to vector<8x16xf32>
    %c0_7 = arith.constant 0 : index
    %c0_8 = arith.constant 0 : index
    %14 = vector.load %arg15[%c0_7, %c0_8] : memref<1x1xf32, #tpu.memory_space<vmem>>, vector<1x1xf32>
    %15 = vector.broadcast %14 : vector<1x1xf32> to vector<8x16xf32>
    %16 = arith.addf %13, %15 : vector<8x16xf32>
    %c0_9 = arith.constant 0 : index
    %c0_10 = arith.constant 0 : index
    %17 = vector.load %arg20[%c0_9, %c0_10] : memref<8x1xf32, #tpu.memory_space<vmem>>, vector<8x1xf32>
    %cst_11 = arith.constant dense<0xFF800000> : vector<8xf32>
    %18 = vector.multi_reduction <maximumf>, %16, %cst_11 [1] : vector<8x16xf32> to vector<8xf32>
    %19 = vector.shape_cast %18 : vector<8xf32> to vector<8x1xf32>
    %20 = arith.maximumf %17, %19 : vector<8x1xf32>
    %21 = arith.subf %17, %20 : vector<8x1xf32>
    %22 = math.exp %21 : vector<8x1xf32>
    %23 = vector.broadcast %20 : vector<8x1xf32> to vector<8x16xf32>
    %24 = arith.subf %16, %23 : vector<8x16xf32>
    %25 = math.exp %24 : vector<8x16xf32>
    %c0_12 = arith.constant 0 : index
    %c0_13 = arith.constant 0 : index
    %26 = vector.load %arg21[%c0_12, %c0_13] : memref<8x1xf32, #tpu.memory_space<vmem>>, vector<8x1xf32>
    %27 = arith.mulf %22, %26 : vector<8x1xf32>
    %cst_14 = arith.constant dense<0.000000e+00> : vector<8xf32>
    %28 = vector.multi_reduction <add>, %25, %cst_14 [1] : vector<8x16xf32> to vector<8xf32>
    %29 = vector.shape_cast %28 : vector<8xf32> to vector<8x1xf32>
    %30 = arith.addf %27, %29 : vector<8x1xf32>
    %c0_15 = arith.constant 0 : index
    %c0_16 = arith.constant 0 : index
    %31 = vector.load %arg21[%c0_15, %c0_16] : memref<8x1xf32, #tpu.memory_space<vmem>>, vector<8x1xf32>
    tpu.vector_store %arg21[%c0_15, %c0_16], %30 {strides = array<i32>} : memref<8x1xf32, #tpu.memory_space<vmem>>, vector<8x1xf32>,
    %32 = vector.shape_cast %25 : vector<8x16xf32> to vector<8x1x16xf32>
    %c0_17 = arith.constant 0 : index
    %c0_18 = arith.constant 0 : index
    %c0_19 = arith.constant 0 : index
    %33 = vector.load %arg5[%c0_17, %c0_18, %c0_19] : memref<8x16x32xf32, #tpu.memory_space<vmem>>, vector<8x16x32xf32>
    "tpu.trace_start"() <{level = 10 : i32, message = "bql,blr->bqr"}> : () -> ()
    %cst_20 = arith.constant dense<0.000000e+00> : vector<8x1x32xf32>
    %34 = tpu.matmul %32, %33, %cst_20 {dimension_numbers = #tpu.dot_dimension_numbers<[2], [1], [1], [2], [0, 0, 0, 1, 1, 2], [0], [0]>} : vector<8x1x16xf32>, vector<8x16x32xf32>, vector<8x1x32xf32> -> vector<8x1x32xf32>
    "tpu.trace_stop"() : () -> ()
    %35 = vector.shape_cast %34 : vector<8x1x32xf32> to vector<8x32xf32>
    %c0_21 = arith.constant 0 : index
    %c0_22 = arith.constant 0 : index
    %36 = vector.load %arg22[%c0_21, %c0_22] : memref<8x32xf32, #tpu.memory_space<vmem>>, vector<8x32xf32>
    %37 = vector.broadcast %22 : vector<8x1xf32> to vector<8x32xf32>
    %38 = arith.mulf %37, %36 : vector<8x32xf32>
    %39 = arith.addf %38, %35 : vector<8x32xf32>
    %c0_23 = arith.constant 0 : index
    %c0_24 = arith.constant 0 : index
    %40 = vector.load %arg22[%c0_23, %c0_24] : memref<8x32xf32, #tpu.memory_space<vmem>>, vector<8x32xf32>
    tpu.vector_store %arg22[%c0_23, %c0_24], %39 {strides = array<i32>} : memref<8x32xf32, #tpu.memory_space<vmem>>, vector<8x32xf32>,
    %c0_25 = arith.constant 0 : index
    %c0_26 = arith.constant 0 : index
    %41 = vector.load %arg20[%c0_25, %c0_26] : memref<8x1xf32, #tpu.memory_space<vmem>>, vector<8x1xf32>
    tpu.vector_store %arg20[%c0_25, %c0_26], %20 {strides = array<i32>} : memref<8x1xf32, #tpu.memory_space<vmem>>, vector<8x1xf32>,
    %c1_i32 = arith.constant 1 : i32
    %42 = arith.cmpi eq, %arg1, %c1_i32 : i32
    %43 = arith.extui %42 : i1 to i32
    %c0_i32_27 = arith.constant 0 : i32
    %44 = arith.cmpi ne, %43, %c0_i32_27 : i32
    scf.if %44 {
      %c0_28 = arith.constant 0 : index
      %c0_29 = arith.constant 0 : index
      %45 = vector.load %arg7[%c0_28, %c0_29] : memref<8x128xf32, #tpu.memory_space<vmem>>, vector<8x128xf32>
      %46 = vector.extract_strided_slice %45 {offsets = [0, 32], sizes = [8, 32], strides = [1, 1]} : vector<8x128xf32> to vector<8x32xf32>
      %47 = vector.extract_strided_slice %45 {offsets = [0, 96], sizes = [8, 32], strides = [1, 1]} : vector<8x128xf32> to vector<8x32xf32>
      %c0_30 = arith.constant 0 : index
      %c0_31 = arith.constant 0 : index
      %48 = vector.load %arg17[%c0_30, %c0_31] : memref<8x32xf32, #tpu.memory_space<vmem>>, vector<8x32xf32>
      %c0_32 = arith.constant 0 : index
      %c0_33 = arith.constant 0 : index
      %49 = vector.load %arg18[%c0_32, %c0_33] : memref<8x32xf32, #tpu.memory_space<vmem>>, vector<8x32xf32>
      %c0_34 = arith.constant 0 : index
      %c0_35 = arith.constant 0 : index
      %50 = vector.load %arg22[%c0_34, %c0_35] : memref<8x32xf32, #tpu.memory_space<vmem>>, vector<8x32xf32>
      %c0_36 = arith.constant 0 : index
      %c0_37 = arith.constant 0 : index
      %51 = vector.load %arg21[%c0_36, %c0_37] : memref<8x1xf32, #tpu.memory_space<vmem>>, vector<8x1xf32>
      %52 = tpu.reciprocal %51 : vector<8x1xf32> -> vector<8x1xf32>
      %53 = vector.broadcast %52 : vector<8x1xf32> to vector<8x32xf32>
      %54 = arith.mulf %50, %53 : vector<8x32xf32>
      %55 = tpu.concatenate %54, %48, %46 in 1 : vector<8x32xf32>, vector<8x32xf32>, vector<8x32xf32> -> vector<8x96xf32>
      %c0_38 = arith.constant 0 : index
      %c0_39 = arith.constant 0 : index
      %56 = vector.load %arg10[%c0_38, %c0_39] : memref<96x128xf32, #tpu.memory_space<vmem>>, vector<96x128xf32>
      %cst_40 = arith.constant dense<0.000000e+00> : vector<8x128xf32>
      %57 = tpu.matmul %55, %56, %cst_40 {dimension_numbers = #tpu.dot_dimension_numbers<[1], [0], [0], [1], [0, 0, 1, 1], [], []>} : vector<8x96xf32>, vector<96x128xf32>, vector<8x128xf32> -> vector<8x128xf32>
      %c0_41 = arith.constant 0 : index
      %c0_42 = arith.constant 0 : index
      %58 = vector.load %arg11[%c0_41, %c0_42] : memref<1x128xf32, #tpu.memory_space<vmem>>, vector<1x128xf32>
      %59 = vector.broadcast %58 : vector<1x128xf32> to vector<8x128xf32>
      %60 = arith.addf %57, %59 : vector<8x128xf32>
      %61 = tpu.iota {dimensions = array<i32: 1>} : vector<8x128xi32>
      %c64_i32 = arith.constant 64 : i32
      %62 = vector.broadcast %c64_i32 : i32 to vector<8x128xi32>
      %63 = arith.cmpi sge, %61, %62 : vector<8x128xi32>
      %c96_i32 = arith.constant 96 : i32
      %64 = vector.broadcast %c96_i32 : i32 to vector<8x128xi32>
      %65 = arith.cmpi slt, %61, %64 : vector<8x128xi32>
      %66 = arith.andi %63, %65 : vector<8x128xi1>
      %67 = math.tanh %60 : vector<8x128xf32>
      %68 = arith.negf %60 : vector<8x128xf32>
      %69 = math.exp %68 : vector<8x128xf32>
      %cst_43 = arith.constant 1.000000e+00 : f32
      %70 = vector.broadcast %cst_43 : f32 to vector<8x128xf32>
      %71 = arith.addf %70, %69 : vector<8x128xf32>
      %72 = arith.divf %70, %71 : vector<8x128xf32>
      %73 = arith.select %66, %67, %72 : vector<8x128xi1>, vector<8x128xf32>
      %74 = vector.extract_strided_slice %73 {offsets = [0, 0], sizes = [8, 32], strides = [1, 1]} : vector<8x128xf32> to vector<8x32xf32>
      %75 = vector.extract_strided_slice %73 {offsets = [0, 32], sizes = [8, 32], strides = [1, 1]} : vector<8x128xf32> to vector<8x32xf32>
      %76 = vector.extract_strided_slice %73 {offsets = [0, 64], sizes = [8, 32], strides = [1, 1]} : vector<8x128xf32> to vector<8x32xf32>
      %77 = vector.extract_strided_slice %73 {offsets = [0, 96], sizes = [8, 32], strides = [1, 1]} : vector<8x128xf32> to vector<8x32xf32>
      %78 = arith.mulf %75, %47 : vector<8x32xf32>
      %79 = arith.mulf %74, %76 : vector<8x32xf32>
      %80 = arith.addf %78, %79 : vector<8x32xf32>
      %81 = math.tanh %80 : vector<8x32xf32>
      %82 = arith.mulf %77, %81 : vector<8x32xf32>
      %83 = tpu.concatenate %48, %82, %49, %80 in 1 : vector<8x32xf32>, vector<8x32xf32>, vector<8x32xf32>, vector<8x32xf32> -> vector<8x128xf32>
      %c0_44 = arith.constant 0 : index
      %c0_45 = arith.constant 0 : index
      %84 = vector.load %arg16[%c0_44, %c0_45] : memref<8x128xf32, #tpu.memory_space<vmem>>, vector<8x128xf32>
      tpu.vector_store %arg16[%c0_44, %c0_45], %83 {strides = array<i32>} : memref<8x128xf32, #tpu.memory_space<vmem>>, vector<8x128xf32>,
    } else {
    }
    return
  }
  func.func @transform_0(%arg0: i32, %arg1: i32) -> (i32, i32) {
    %c0_i32 = arith.constant 0 : i32
    %c0_i32_0 = arith.constant 0 : i32
    return %arg0, %c0_i32 : i32, i32
  }
  func.func @transform_1(%arg0: i32, %arg1: i32) -> (i32, i32) {
    %c0_i32 = arith.constant 0 : i32
    %c0_i32_0 = arith.constant 0 : i32
    return %arg0, %c0_i32 : i32, i32
  }
  func.func @transform_2(%arg0: i32, %arg1: i32) -> (i32, i32) {
    %c0_i32 = arith.constant 0 : i32
    %c0_i32_0 = arith.constant 0 : i32
    %c0_i32_1 = arith.constant 0 : i32
    return %c0_i32, %c0_i32_0 : i32, i32
  }
  func.func @transform_3(%arg0: i32, %arg1: i32) -> (i32, i32, i32) {
    %c0_i32 = arith.constant 0 : i32
    %c0_i32_0 = arith.constant 0 : i32
    return %arg0, %arg1, %c0_i32 : i32, i32, i32
  }
  func.func @transform_4(%arg0: i32, %arg1: i32) -> (i32, i32, i32) {
    %c0_i32 = arith.constant 0 : i32
    %c0_i32_0 = arith.constant 0 : i32
    return %arg0, %arg1, %c0_i32 : i32, i32, i32
  }
  func.func @transform_5(%arg0: i32, %arg1: i32) -> (i32, i32) {
    %c0_i32 = arith.constant 0 : i32
    %c0_i32_0 = arith.constant 0 : i32
    return %arg0, %c0_i32 : i32, i32
  }
  func.func @transform_6(%arg0: i32, %arg1: i32) -> (i32, i32) {
    %c0_i32 = arith.constant 0 : i32
    %c0_i32_0 = arith.constant 0 : i32
    %c0_i32_1 = arith.constant 0 : i32
    return %c0_i32, %c0_i32_0 : i32, i32
  }
  func.func @transform_7(%arg0: i32, %arg1: i32) -> (i32, i32) {
    %c0_i32 = arith.constant 0 : i32
    %c0_i32_0 = arith.constant 0 : i32
    %c0_i32_1 = arith.constant 0 : i32
    return %c0_i32, %c0_i32_0 : i32, i32
  }
  func.func @transform_8(%arg0: i32, %arg1: i32) -> (i32, i32) {
    %c0_i32 = arith.constant 0 : i32
    %c0_i32_0 = arith.constant 0 : i32
    %c0_i32_1 = arith.constant 0 : i32
    return %c0_i32, %c0_i32_0 : i32, i32
  }
  func.func @transform_9(%arg0: i32, %arg1: i32) -> (i32, i32) {
    %c0_i32 = arith.constant 0 : i32
    %c0_i32_0 = arith.constant 0 : i32
    %c0_i32_1 = arith.constant 0 : i32
    return %c0_i32, %c0_i32_0 : i32, i32
  }
  func.func @transform_10(%arg0: i32, %arg1: i32) -> (i32, i32) {
    %c0_i32 = arith.constant 0 : i32
    %c0_i32_0 = arith.constant 0 : i32
    %c0_i32_1 = arith.constant 0 : i32
    return %c0_i32, %c0_i32_0 : i32, i32
  }
  func.func @transform_11(%arg0: i32, %arg1: i32) -> (i32, i32) {
    %c0_i32 = arith.constant 0 : i32
    %c0_i32_0 = arith.constant 0 : i32
    %c0_i32_1 = arith.constant 0 : i32
    return %c0_i32, %c0_i32_0 : i32, i32
  }
  func.func @transform_12(%arg0: i32, %arg1: i32) -> (i32, i32) {
    %c0_i32 = arith.constant 0 : i32
    %c0_i32_0 = arith.constant 0 : i32
    %c0_i32_1 = arith.constant 0 : i32
    return %c0_i32, %c0_i32_0 : i32, i32
  }
  func.func @transform_13(%arg0: i32, %arg1: i32) -> (i32, i32) {
    %c0_i32 = arith.constant 0 : i32
    %c0_i32_0 = arith.constant 0 : i32
    %c0_i32_1 = arith.constant 0 : i32
    return %c0_i32, %c0_i32_0 : i32, i32
  }
  func.func @transform_14(%arg0: i32, %arg1: i32) -> (i32, i32) {
    %c0_i32 = arith.constant 0 : i32
    %c0_i32_0 = arith.constant 0 : i32
    return %arg0, %c0_i32 : i32, i32
  }
}

</mosaic_0001>

<bundles_post_ra>
// kernel: self_att_core.1
= control target key start
LH: loop header
LB: loop body
LE: loop exit
PB: predicated region body
PF: predicated region fallthrough
CT: control target
= control target key end

     0   :  { %s4266_s0 = inlined_call_operand.hbm [shape: f32[16,32], index: 0, kind: input, shape index: {}]   ;;  %s4267_s1 = inlined_call_operand.vmem [shape: f32[16,32], index: 1, kind: input, shape index: {}, may-alias: {1,2}]   ;;  %s4268_s2 = inlined_call_operand.vmem [shape: f32[16,32], index: 2, kind: input, shape index: {}, may-alias: {1,2}]   ;;  %s4269_s3 = inlined_call_operand.hbm [shape: f32[16,32,32], index: 3, kind: input, shape index: {}]   ;;  %s4270_s4 = inlined_call_operand.hbm [shape: f32[16,32,32], index: 4, kind: input, shape index: {}]   ;;  %s4271_s5 = inlined_call_operand.vmem [shape: f32[16,128], index: 5, kind: input, shape index: {}, may-alias: {5,14}]   ;;  %s4272_s6 = inlined_call_operand.vmem [shape: f32[128,128], index: 6, kind: input, shape index: {}]   ;;  %s4273_s7 = inlined_call_operand.vmem [shape: f32[1,128], index: 7, kind: input, shape index: {}]   ;;  %s4274_s8 = inlined_call_operand.vmem [shape: f32[96,128], index: 8, kind: input, shape index: {}]   ;;  %s4275_s9 = inlined_call_operand.vmem [shape: f32[1,128], index: 9, kind: input, shape index: {}]   ;;  %s4276_s10 = inlined_call_operand.hbm [shape: f32[32,32], index: 10, kind: input, shape index: {}]   ;;  %s4277_s11 = inlined_call_operand.vmem [shape: f32[1,32], index: 11, kind: input, shape index: {}]   ;;  %s4278_s12 = inlined_call_operand.vmem [shape: f32[1,32], index: 12, kind: input, shape index: {}]   ;;  %s4279_s13 = inlined_call_operand.<no memory space> [shape: f32[1,1], index: 13, kind: input, shape index: {}]   ;;  %s4280_s14 = inlined_call_operand.vmem [shape: f32[16,128], index: 14, kind: output, shape index: {}, may-alias: {5,14}]  }
   0x1   :  { %4295 = sst [smem:[#allocation31_spill]] %s4266_s0  ;;  %v19_v0 = vstv %s4279_s13 }
   0x2   :  { %4296 = sst [smem:[#allocation32_spill]] %s4268_s2  ;;  %20 = vst [vmem:[#allocation8] sm:$0x1] %v19_v0 }
   0x3   :  { %4297 = sst [smem:[#allocation33_spill]] %s4271_s5 }
   0x4   :  { %4298 = sst [smem:[#allocation34_spill]] %s4272_s6 }
   0x5   :  { %4299 = sst [smem:[#allocation35_spill]] %s4273_s7 }
   0x6   :  { %4300 = sst [smem:[#allocation36_spill]] %s4274_s8 }
   0x7   :  { %4301 = sst [smem:[#allocation37_spill]] %s4275_s9 }
   0x8   :  { %4302 = sst [smem:[#allocation38_spill]] %s4276_s10 }
   0x9   :  { %4303 = sst [smem:[#allocation39_spill]] %s4277_s11 }
   0xa   :  { %4304 = sst [smem:[#allocation40_spill]] %s4278_s12 }
   0xb   :  { %4305 = sst [smem:[#allocation41_spill]] %s4280_s14 }
   0xc   :  { %21 = vsyncpa [#allocation10], 0 }
   0xd   :  { %23 = vsyncpa [#allocation10 + $0x1], 0 }
   0xe   :  { %24 = vsyncpa [#allocation12], 0 }
   0xf   :  { %26 = vsyncpa [#allocation12 + $0x1], 0 }
  0x10   :  { %27 = vsyncpa [#allocation15], 0  ;;  %s3502_s15 = smov 0   ;;  %s3504_s16 = smov 0  }
  0x11   :  { %s3506_s17 = smov 0   ;;  %s3508_s18 = smov 0  }
  0x12   :  { %s3510_s19 = smov 0   ;;  %s3512_s20 = smov 0  }
  0x13   :  { %s3514_s21 = smov 0   ;;  %s3516_s13 = smov 0  }
  0x14   :  { %s3518_s22 = smov 0   ;;  %s3520_s23 = smov 0  }
  0x15   :  { %s3522_s24 = smov 0  }
  0x16 LB: > { %4306 = sst [smem:[#allocation25_spill]] %s3372_s21  ;;  %s4281_s25 = sadd.s32 4294967295, %s3388_s24   ;;  %s3388_s24 = sphi %s3522_s24, %s33_s24   ;;  %s3384_s23 = sphi %s3520_s23, %s4344_s23   ;;  %s3380_s22 = sphi %s3518_s22, %s4352_s22   ;;  %s3376_s13 = sphi %s3516_s13, %s4342_s13   ;;  %s3372_s21 = sphi %s3514_s21, %s4351_s21   ;;  %s3368_s20 = sphi %s3512_s20, %s4350_s20   ;;  %s3364_s19 = sphi %s3510_s19, %s4349_s19   ;;  %s3360_s18 = sphi %s3508_s18, %s4348_s18   ;;  %s3356_s17 = sphi %s3506_s17, %s4347_s17   ;;  %s3352_s16 = sphi %s3504_s16, %s4346_s16   ;;  %s3348_s15 = sphi %s3502_s15, %s4345_s15  }
  0x17   : > { %4307 = sst [smem:[#allocation26_spill]] %s3384_s23  ;;  %s42_s26 = sadd.s32 1, %s3380_s22 }
  0x18   : > { %p43_p0 = scmp.ge.s32.totalorder %s42_s26, 2  ;;  %s45_s27 = sadd.s32 1, %s3384_s23 }
  0x19   : > { %s52_s28 = sadd.s32 1, %s3368_s20  ;;  %p59_p1 = scmp.ne.s32.totalorder %s3368_s20, %s3364_s19 }
  0x1a   : > { %s4354_s26 = smov (%p43_p0, %s42_s26), 0  ;;  %s4356_s27 = smov (!%p43_p0, %s45_s27), %s3384_s23 }
  0x1b   : > { %4308 = sst [smem:[#allocation27_spill]] %s4354_s26  ;;  %p60_p2 = scmp.eq.s32.totalorder %s3388_s24, 0 }
  0x1c   : > { %p65_p3 = scmp.ne.s32.totalorder %s3364_s19, %s3360_s18  ;;  %p47_p4 = scmp.ge.s32.totalorder %s4356_s27, 2 }
  0x1d   : > { %p3568_p5 = scmp.eq.s32.totalorder %s4281_s25, 0  ;;  %p3574_p6 = por %p60_p2, %p59_p1 }
  0x1e   : > { %s123_s9 = ssub.s32 %s3380_s22, %s4354_s26  ;;  %s4358_s27 = smov (%p47_p4, %s4356_s27), 0 }
  0x1f   : > { %s4309_s29 = scalar_select %p3568_p5, 1, 0 }
  0x20   : > { %s4310_s30 = scalar_select %p3574_p6, 1, 0 }
  0x21   : > { %4311 = sst [smem:[#allocation28_spill]] %s4358_s27  ;;  %p3584_p7 = por %p3568_p5, %p65_p3 }
  0x22   : > { %s127_s25 = sadd.s32 1, %s3356_s17  ;;  %s49_s8 = ssub.s32 %s3384_s23, %s4358_s27 }
  0x23   : > { %s4312_s18 = scalar_select %p3584_p7, 1, 0 }
  0x24   : > { %p134_p8 = scmp.ne.s32.totalorder %s3356_s17, %s3352_s16  ;;  %p50_p9 = scmp.eq.s32.totalorder %s49_s8, 0 }
  0x25   : > { %s124_s12 = sor.u32 %s123_s9, %s49_s8  ;;  %p140_p12 = scmp.ne.s32.totalorder %s3352_s16, %s3348_s15 }
  0x26   : > { %p125_p10 = scmp.eq.s32.totalorder %s124_s12, 0  ;;  %p3595_p11 = por %p134_p8, %p60_p2 }
  0x27   : > { %s3600_s26 = scalar_select %p50_p9, %s3368_s20, %s52_s28  }
  0x28   : > { %s4313_s11 = scalar_select %p3595_p11, 1, 0 }
  0x29   : > { %4314 = sst [smem:[#allocation29_spill]] %s3600_s26  ;;  %p2650_p13 = scmp.ge.s32.totalorder %s3388_s24, 1 }
  0x2a   : > { %s3603_s7 = scalar_select %p125_p10, %s3356_s17, %s127_s25  }
  0x2b   : > { %p399_p0 = scmp.lt.s32.totalorder %s3388_s24, 5  ;;  %p3611_p1 = por %p140_p12, %p3568_p5 }
  0x2c   : > { %4315 = sst [smem:[#allocation30_spill]] %s3603_s7  ;;  %s3390_s9 = smov [#allocation14]  }
  0x2d   : > { %s4316_s27 = scalar_select %p3611_p1, 1, 0 }
  0x2e   : > { %p3615_p3 = pnand %p2650_p13, %p399_p0  ;;  %s426_s12 = sshll.u32 %s3390_s9, 4  ;;  %s427_s12 = int_to_ptr.vmem [resolvable:$true] %s426_s12 }
  0x2f   : > { %s4319_s10 = sld [smem:[#allocation38_spill]] }
  0x30   : > { %s4317_s8 = scalar_select %p3615_p3, 1, 0 }
  0x31   : > { %p3015_p2 = pneg %p3615_p3 }
  0x33   : > { %p3623_p4 = pnand %p3015_p2, %p3568_p5 }
  0x35   : > { %s3234_s26 = scalar_lea.hbm %s4319_s10, 512  ;;  %p3236_p9 = pneg %p3623_p4 }
  0x36   : > { %p3235_p8 = scmp.ne.s32.totalorder %s4319_s10, %s3234_s26  ;;  %p3241_p13 = scmp.lt.u32.totalorder %s3234_s26, %s4319_s10 }
  0x38   : > { %p3237_p10 = pnand %p3236_p9, %p3235_p8 }
  0x3a   : > { %p3238_p12 = pneg %p3237_p10 }
  0x3c   : > { %p3243_p0 = pnand %p3241_p13, %p3238_p12 }
  0x3e   : > { %3246 = shalt.err (!%p3243_p0)
}
  0x3f   : > { %s3247_s21 = scalar_lea.vmem %s427_s12, 512  ;;  %p3255_p7 = scmp.lt.s32.totalorder %s427_s12, %s427_s12 }
  0x40   : > { %p3248_p2 = scmp.ne.s32.totalorder %s427_s12, %s3247_s21  ;;  %p3256_p3 = scmp.lt.s32.totalorder %s3247_s21, %s3247_s21 }
  0x42   : > { %p3250_p5 = pnand %p3248_p2, %p3236_p9  ;;  %p3257_p11 = por %p3256_p3, %p3255_p7 }
  0x44   : > { %p3251_p1 = pneg %p3250_p5 }
  0x46   : > { %p3258_p6 = pnand %p3257_p11, %p3251_p1 }
  0x48   : > { %3261 = shalt.err (!%p3258_p6)
}
  0x49   : > { %s3391_s6 = smov 128   ;;  %s3392_s7 = smov 8  }
  0x4a   : > { %3018 = dma.hbm_to_vmem [thread:$0]  (!%p3623_p4), %s4319_s10, 512, %s427_s12, [#allocation15], %s3391_s6, %s3391_s6, %s3392_s7  }
  0x4b   : > { %p2652_p8 = scmp.ge.s32.totalorder %s3388_s24, 4 }
  0x4c   : > { %s449_s2 = sand.u32 (!%p2652_p8), 1, %s3368_s20   ;;  %s2654_s26 = sshll.u32 (!%p2652_p8), %s3384_s23, 7 }
  0x4d   : > { %445 = sbr.rel (%p2652_p8) target bundleno = 137 (0x89), region = 52  ;;  %s2653_s21 = sshll.u32 (!%p2652_p8), %s449_s2, 3 }
  0x4e   : > { %s4320_s0 = sld [smem:[#allocation31_spill]] (!%p2652_p8)  ;;  %s453_s15 = scalar_lea.vmem (!%p2652_p8), [#allocation9], %s2653_s21 }
  0x4f   : > { %s460_s12 = sshll.u32 (!%p2652_p8), %s453_s15, 4  ;;  %s450_s6 = scalar_lea.sflag (!%p2652_p8), [#allocation10], %s449_s2  ;;  %s461_s12 = int_to_ptr.vmem [resolvable:$true] %s460_s12 }
  0x50   : > { %p4321_p6 = scmp.ne.s32.totalorder (!%p2652_p8), %s4310_s30, 0 }
  0x54   : > { %s3649_s5 = scalar_lea.hbm %s4320_s0, %s2654_s26  ;;  %s3266_s10 = scalar_lea.hbm %s4320_s0, 256 }
  0x55   : > { %s3262_s7 = scalar_lea.hbm %s3649_s5, 128  ;;  %p3267_p1 = scmp.lt.u32.totalorder %s3649_s5, %s4320_s0 }
  0x56   : > { %p3263_p5 = scmp.ne.s32.totalorder %s3649_s5, %s3262_s7  ;;  %p3268_p3 = scmp.lt.u32.totalorder %s3266_s10, %s3262_s7 }
  0x57   : > { %p3270_p9 = scmp.lt.u32.totalorder %s3262_s7, %s3649_s5 }
  0x58   : > { %p3264_p7 = pnand %p3263_p5, %p4321_p6  ;;  %p3269_p4 = por %p3268_p3, %p3267_p1 }
  0x5a   : > { %p3265_p11 = pneg %p3264_p7  ;;  %p3271_p10 = por %p3270_p9, %p3269_p4 }
  0x5c   : > { %p3272_p12 = pnand %p3271_p10, %p3265_p11 }
  0x5e   : > { %3275 = shalt.err (!%p3272_p12)
}
  0x5f   : > { %s3276_s2 = scalar_lea.vmem %s461_s12, 128  ;;  %s3393_s21 = smov [#allocation9]  }
  0x60   : > { %p3277_p13 = scmp.ne.s32.totalorder %s461_s12, %s3276_s2  ;;  %s3280_s9 = sshll.u32 %s3393_s21, 4  ;;  %s3281_s9 = int_to_ptr.vmem [resolvable:$false] %s3280_s9 }
  0x61   : > { %s3282_s15 = scalar_lea.vmem %s3281_s9, 256  ;;  %p3283_p8 = scmp.lt.s32.totalorder %s461_s12, %s3281_s9 }
  0x62   : > { %p3278_p0 = pnand %p3277_p13, %p4321_p6  ;;  %p3284_p5 = scmp.lt.s32.totalorder %s3282_s15, %s3276_s2 }
  0x64   : > { %p3279_p2 = pneg %p3278_p0  ;;  %p3285_p7 = por %p3284_p5, %p3283_p8 }
  0x66   : > { %p3286_p1 = pnand %p3285_p7, %p3279_p2 }
  0x68   : > { %3289 = shalt.err (!%p3286_p1)
}
  0x69   : > { %2993 = dma.hbm_to_vmem [thread:$0]  (%p4321_p6), %s3649_s5, 128, %s461_s12, %s450_s6  }
  0x6a   : > { %s476_s10 = sand.u32 1, %s3356_s17   ;;  %s2657_s25 = sshll.u32 %s3380_s22, 1 }
  0x6b   : > { %s3669_s7 = sshll.u32 %s476_s10, 7  ;;  %s2702_s28 = sshll.u32 %s3384_s23, 5 }
  0x6c   : > { %s474_s14 = sand.u32 1, %s3388_s24   ;;  %s485_s30 = sadd.s32 %s2702_s28, %s2657_s25 }
  0x6d   : > { %s478_s26 = scalar_lea.vmem [#allocation11], %s3669_s7  ;;  %s2659_s12 = sshll.u32 %s485_s30, 7 }
  0x6e   : > { %s500_s5 = sshll.u32 %s478_s26, 4  ;;  %s3394_s6 = smov 512   ;;  %s501_s5 = int_to_ptr.vmem [resolvable:$true] %s500_s5 }
  0x6f   : > { %p4322_p6 = scmp.ne.s32.totalorder %s4313_s11, 0  ;;  %s3395_s9 = smov 256  }
  0x70   : > { %s3396_s15 = smov 2   ;;  %s3397_s10 = smov 128  }
  0x71   : > { %2995 = sst [smem:[#allocation17]] (%p4322_p6), %s3394_s6  ;;  %s3398_s25 = smov 8  }
  0x72   : > { %s2994_s2 = scalar_select %p4322_p6, [#allocation0], [#allocation20] }
  0x73   : > { %2996 = sst [smem:[#allocation17 + $0x1]] (%p4322_p6), %s3395_s9  ;;  %s487_s26 = scalar_lea.hbm %s4269_s3, %s2659_s12 }
  0x74   : > { %s492_s21 = sld [smem:[%s2994_s2]]   ;;  %s475_s0 = scalar_lea.sflag [#allocation12], %s474_s14 }
  0x75   : > { %2997 = sst [smem:[#allocation17 + $0x2]] (%p4322_p6), %s3396_s15  ;;  %s3399_s9 = smov [#allocation16]  }
  0x76   : > { %2998 = sst [smem:[#allocation17 + $0x3]] (%p4322_p6), %s3397_s10 }
  0x77   : > { %2999 = sst [smem:[#allocation17 + $0x4]] (%p4322_p6), %s3397_s10 }
  0x78   : > { %3000 = sst [smem:[#allocation17 + $0x5]] (%p4322_p6), %s3398_s25 }
  0x7a   : > { %s2660_s6 = sshll.u32 %s492_s21, 26 }
  0x7b   : > { %s2661_s2 = sadd.s32 134217728, %s2660_s6 }
  0x7c   : > { %3001 = dma.general (%p4322_p6), %s487_s26, 2048, %s501_s5, %s475_s0, %s3399_s9, [#allocation17], %s2661_s2, 0  }
  0x7d   : > { %s536_s10 = scalar_lea.hbm %s4270_s4, %s2659_s12  ;;  %s527_s21 = scalar_lea.vmem [#allocation13], %s3669_s7 }
  0x7e   : > { %s3002_s25 = scalar_select %p4322_p6, [#allocation0], [#allocation21] }
  0x7f   : > { %s549_s28 = sshll.u32 %s527_s21, 4  ;;  %s3400_s5 = smov 512   ;;  %s550_s28 = int_to_ptr.vmem [resolvable:$true] %s549_s28 }
  0x80   : > { %s541_s14 = sld [smem:[%s3002_s25]]   ;;  %s3401_s23 = smov 256  }
  0x81   : > { %3003 = sst [smem:[#allocation19]] (%p4322_p6), %s3400_s5  ;;  %s3402_s30 = smov 2  }
  0x82   : > { %3004 = sst [smem:[#allocation19 + $0x1]] (%p4322_p6), %s3401_s23  ;;  %s3403_s26 = smov 128  }
  0x83   : > { %3005 = sst [smem:[#allocation19 + $0x2]] (%p4322_p6), %s3402_s30  ;;  %s3404_s7 = smov 8  }
  0x84   : > { %3006 = sst [smem:[#allocation19 + $0x3]] (%p4322_p6), %s3403_s26  ;;  %s3405_s2 = smov [#allocation18]  }
  0x85   : > { %3007 = sst [smem:[#allocation19 + $0x4]] (%p4322_p6), %s3403_s26 }
  0x86   : > { %s2667_s12 = sshll.u32 %s541_s14, 26  ;;  %3008 = sst [smem:[#allocation19 + $0x5]] (%p4322_p6), %s3404_s7 }
  0x87   : > { %s2668_s6 = sadd.s32 134217728, %s2667_s12 }
  0x88   : > { %3009 = dma.general (%p4322_p6), %s536_s10, 2048, %s550_s28, %s475_s0, %s3405_s2, [#allocation19], %s2668_s6, 0  }
  0x89 PF: > { %p4323_p11 = scmp.ne.s32.totalorder %s4317_s8, 0 }
  0x8a   : > { %s583_s9 = sand.u32 (!%p4323_p11), 1, %s3364_s19   ;;  %p4324_p3 = scmp.ne.s32.totalorder (!%p4323_p11), %s4312_s18, 0 }
  0x8b   : > { %581 = sbr.rel (%p4323_p11) target bundleno = 3677 (0xe5d), region = 76  ;;  %s3717_s15 = sshll.u32 (!%p4323_p11), %s583_s9, 3 }
  0x8c   : > { %s584_s25 = scalar_lea.sflag (!%p4323_p11), [#allocation10], %s583_s9  ;;  %s587_s21 = scalar_lea.vmem (!%p4323_p11), [#allocation9], %s3717_s15 }
  0x92   : > { %3335 = dma.done.wait (%p4324_p3), %s584_s25, 128  }
  0x93   : > { %3337 = vsyncadd (%p4324_p3), %s584_s25, 4294967168  ;;  %s4325_s11 = sadd.s32 4294967295, %s3388_s24   ;;  %s594_s8 = sand.u32 1, %s3352_s16  }
  0x94   : > { %s592_s0 = sand.u32 1, %s4325_s11   ;;  %s2671_s10 = sshll.u32 %s594_s8, 7 }
  0x95   : > { %s593_s28 = scalar_lea.sflag [#allocation12], %s592_s0  ;;  %s3727_s14 = scalar_lea.vmem [#allocation11], %s2671_s10 }
  0x96   : > { %p4326_p4 = scmp.ne.s32.totalorder %s4316_s27, 0 }
  0x98   : > { %3339 = dma.done.wait (%p4326_p4), %s593_s28, 4096  }
  0x99   : > { %3341 = vsyncadd (%p4326_p4), %s593_s28, 4294963200  ;;  %s3733_s5 = scalar_lea.vmem [#allocation13], %s2671_s10  ;;  %p4327_p9 = scmp.ne.s32.totalorder %s4309_s29, 0 }
  0x9b   : > { %3343 = dma.done.wait (%p4327_p9), [#allocation15], 512  }
  0x9c   : > { %3345 = vsyncadd (%p4327_p9), [#allocation15], 4294966784  ;;  %p671_p10 = scmp.lt.s32.totalorder %s3376_s13, 1  ;;  %s4328_s7 = sld [smem:[#allocation33_spill]] }
  0x9d   : > { %s4329_s9 = sld [smem:[#allocation41_spill]]  ;;  %s4330_s11 = sld [smem:[#allocation25_spill]] }
  0x9e   : > { %s4360_s13 = smov (!%p671_p10, %s3376_s13), 1 }
  0x9f   : > { %s3741_s18 = sshll.u32 %s4360_s13, 3 }
  0xa0   : > { %s674_s27 = scalar_lea.vmem %s4267_s1, %s3741_s18 }
  0xa2   : > { %s3751_s6 = scalar_lea.vmem %s4328_s7, %s3741_s18 }
  0xa3   : > { %s686_s25 = scalar_lea.vmem %s4329_s9, %s3741_s18  ;;  %p2677_p12 = scmp.ne.s32.totalorder %s4330_s11, 0 }
  0xa4   : > { %s4331_s8 = sld [smem:[#allocation32_spill]] (!%p2677_p12)  ;;  %vm695_vm0 = vcmask (!%p2677_p12), 261120   ;;  %v3406_v3 = vmov (!%p2677_p12), 0.0|0.0   ;;  %vm3407_vm2 = vmmov (!%p2677_p12), 0   ;;  %v3408_v5 = vmov (!%p2677_p12), 0.0   ;;  %v692_v7 = vld [vmem:[%s674_s27] sm:$0xff] (!%p2677_p12) }
  0xa5   : > { %690 = sbr.rel (%p2677_p12) target bundleno = 1971 (0x7b3), region = 96  ;;  %2912 = vmatprep.subr.bf16.mxu0 (!%p2677_p12), %v3406_v3  ;;  %vm2914_vm1 = vmpackc.low (!%p2677_p12), %vm695_vm0, %vm695_vm0  ;;  %2773 = vmatprep.mubr.msk.f32.mxu0 (!%p2677_p12), %vm3407_vm2, %v3408_v5  ;;  %vm1096_vm3 = vcmask (!%p2677_p12), 7168   ;;  %1099 = vst.msk [vmem:[#allocation7] sm:$0xff] (!%p2677_p12), %vm695_vm0, %v3408_v5  ;;  %v3409_v6 = vmov (!%p2677_p12), -inf   ;;  %vm776_vm4 = vcmask (!%p2677_p12), 130048   ;;  %v691_v17 = vld [vmem:[%s3751_s6] sm:$0xff] (!%p2677_p12)  ;;  %v972_v60 = vlaneseq (!%p2677_p12) }
  0xa6   : > { %1097 = vst.msk [vmem:[#allocation5] sm:$0xff] (!%p2677_p12), %vm1096_vm3, %v3409_v6  ;;  %1098 = vst.msk [vmem:[#allocation6] sm:$0xff] (!%p2677_p12), %vm1096_vm3, %v3408_v5  ;;  %2919 = vmatprep.subr.bf16.mxu1 (!%p2677_p12), %v3406_v3  ;;  %2815 = vmatprep.mubr.msk.f32.mxu1 (!%p2677_p12), %vm3407_vm2, %v3408_v5  ;;  %s3410_s23 = smov (!%p2677_p12), 96   ;;  %v861_v21 = vld [vmem:[%s587_s21] sm:$0xff] (!%p2677_p12)  ;;  %s4332_s26 = sld [smem:[#allocation34_spill]] (!%p2677_p12)  ;;  %vm875_vm5 = vcmask (!%p2677_p12), 523264  }
  0xa7   : > { %863 = vrot.lane.b32.xlu1 (!%p2677_p12), %v691_v17, %s3410_s23  ;;  %s3411_s29 = smov (!%p2677_p12), 64   ;;  %s3412_s11 = smov (!%p2677_p12), 32   ;;  %vm877_vm6 = vcmask (!%p2677_p12), 785408   ;;  %v973_v62 = vand.u32 (!%p2677_p12), 127, %v972_v60 }
  0xa8   : > { %s4333_s21 = sld [smem:[#allocation35_spill]] (!%p2677_p12)  ;;  %s4334_s28 = sld [smem:[#allocation39_spill]] (!%p2677_p12) }
  0xa9   : > { %vm974_vm7 = vcmp.ge.s32.totalorder (!%p2677_p12), %v973_v62, 64  ;;  %vm975_vm8 = vcmp.lt.s32.totalorder (!%p2677_p12), %v973_v62, 96 }
  0xaa   : > { %v693_v1 = vld [vmem:[%s4331_s8] sm:$0xff] (!%p2677_p12)  ;;  %v694_v2 = vld [vmem:[%s4331_s8 + $0x8] sm:$0xff] (!%p2677_p12)  ;;  %vm976_vm9 = vmand (!%p2677_p12), %vm974_vm7, %vm975_vm8 }
  0xab   : > { %v2913_v4 = vpack.c.bf16 (!%p2677_p12), %v694_v2, %v693_v1 }
  0xac   : > { %v879_v22 = vld [vmem:[%s4332_s26] sm:$0xff]  ;;  %v880_v23 = vld [vmem:[%s4332_s26 + $0x8] sm:$0xff]  ;;  %v881_v25 = vld [vmem:[%s4332_s26 + $0x10] sm:$0xff] }
  0xad   : > { %2915 = vmatpush3.bf16.xpose.msk.msra.mxu0 %vm2914_vm1, %v2913_v4  ;;  %v2920_v24 = vpack.c.bf16 %v880_v23, %v879_v22  ;;  %v882_v26 = vld [vmem:[%s4332_s26 + $0x18] sm:$0xff]  ;;  %v883_v28 = vld [vmem:[%s4332_s26 + $0x20] sm:$0xff]  ;;  %v884_v29 = vld [vmem:[%s4332_s26 + $0x28] sm:$0xff] }
  0xae   : > { %2916 = vmatprep.subr.bf16.mxu0 %v3406_v3  ;;  %v2923_v27 = vpack.c.bf16 %v882_v26, %v881_v25  ;;  %v2926_v30 = vpack.c.bf16 %v884_v29, %v883_v28  ;;  %v885_v31 = vld [vmem:[%s4332_s26 + $0x30] sm:$0xff]  ;;  %v886_v32 = vld [vmem:[%s4332_s26 + $0x38] sm:$0xff]  ;;  %v887_v34 = vld [vmem:[%s4332_s26 + $0x40] sm:$0xff] }
  0xaf   : > { %2921 = vmatpush3.bf16.msra.mxu1 %v2920_v24  ;;  %v2929_v33 = vpack.c.bf16 %v886_v32, %v885_v31  ;;  %v888_v35 = vld [vmem:[%s4332_s26 + $0x48] sm:$0xff]  ;;  %v889_v37 = vld [vmem:[%s4332_s26 + $0x50] sm:$0xff]  ;;  %v890_v38 = vld [vmem:[%s4332_s26 + $0x58] sm:$0xff] }
  0xb0   : > { %2922 = vmatprep.subr.bf16.mxu1 %v3406_v3  ;;  %v2932_v36 = vpack.c.bf16 %v888_v35, %v887_v34  ;;  %v2935_v39 = vpack.c.bf16 %v890_v38, %v889_v37  ;;  %v891_v40 = vld [vmem:[%s4332_s26 + $0x60] sm:$0xff]  ;;  %v892_v41 = vld [vmem:[%s4332_s26 + $0x68] sm:$0xff]  ;;  %v893_v43 = vld [vmem:[%s4332_s26 + $0x70] sm:$0xff] }
  0xb1   : > { %v2938_v42 = vpack.c.bf16 %v892_v41, %v891_v40  ;;  %v894_v44 = vld [vmem:[%s4332_s26 + $0x78] sm:$0xff]  ;;  %v2682_v54 = vld [vmem:[%s4333_s21] ss:$0 sm:$0xff] }
  0xb2   : > { %v2941_v45 = vpack.c.bf16 %v894_v44, %v893_v43 }
  0xb3   : > { %2924 = vmatpush3.bf16.msra.mxu1 %v2923_v27 }
  0xb4   : > { %2774 = vmatmul.mubr.msk.f32.vlgmr.msra.gmra.mrb[0].mxu0 %vm695_vm0, %v692_v7  ;;  %2925 = vmatprep.subr.bf16.mxu1 %v3406_v3 }
  0xb5   : > { %2918 = vmatpush3.bf16.msra.mxu0 %v2913_v4  ;;  %2780 = vmatprep.mubr.msk.f32.mxu0 %vm3407_vm2, %v3408_v5 }
  0xb6   : > { %2943 = vmatprep.subr.bf16.mxu0 %v3406_v3 }
  0xb7   : > { %2927 = vmatpush3.bf16.msra.mxu1 %v2926_v30 }
  0xb8   : > { %2928 = vmatprep.subr.bf16.mxu1 %v3406_v3 }
  0xbb   : > { %2930 = vmatpush3.bf16.msra.mxu1 %v2929_v33 }
  0xbc   : > { %2931 = vmatprep.subr.bf16.mxu1 %v3406_v3 }
  0xbf   : > { %2933 = vmatpush3.bf16.msra.mxu1 %v2932_v36 }
  0xc0   : > { %2934 = vmatprep.subr.bf16.mxu1 %v3406_v3 }
  0xc3   : > { %2936 = vmatpush3.bf16.msra.mxu1 %v2935_v39 }
  0xc4   : > { %2937 = vmatprep.subr.bf16.mxu1 %v3406_v3 }
  0xc7   : > { %2939 = vmatpush3.bf16.msra.mxu1 %v2938_v42 }
  0xc8   : > { %2940 = vmatprep.subr.bf16.mxu1 %v3406_v3 }
  0xcb   : > { %2942 = vmatpush3.bf16.msra.mxu1 %v2941_v45 }
 0x119   : > { %v864_v48 = vpop.permute.xlu1 %863 }
 0x187   : > { %v771_v8 = vpop.f32.mrb[0].mxu0 }
 0x188   : > { %v775_v9 = vmul.f32 0.17677669, %v771_v8  ;;  %v2775_v10 = vpop.f32.mrb[1].mxu0  ;;  %v1012_v8 = vld [vmem:[#allocation14] sm:$0xff] }
 0x189   : > { %v1014_v10 = vld [vmem:[#allocation14 + $0x10] sm:$0xff] }
 0x18a   : > { %v777_v11 = vsel %vm776_vm4, %v775_v9, -inf }
 0x18b   : > { %778 = vmax.xlane.f32.xlu0 %v777_v11 }
 0x218   : > { %v779_v12 = vpop.xlane.xlu0 %778 }
 0x219   : > { %v780_v13 = vsub.f32 %v775_v9, %v779_v12  ;;  %v1013_v9 = vld [vmem:[#allocation14 + $0x8] sm:$0xff]  ;;  %v1015_v12 = vld [vmem:[#allocation14 + $0x18] sm:$0xff] }
 0x21a   : > { %v2944_v11 = vpack.c.bf16 %v1013_v9, %v1012_v8 }
 0x21b   : > { %v781_v14 = vmul.f32 1.442695, %v780_v13  ;;  %v2947_v13 = vpack.c.bf16 %v1015_v12, %v1014_v10 }
 0x21d   : > { %3142 = vpow2.f32 %v781_v14 }
 0x227   : > { %v3143_v15 = vpop.eup %3142 }
 0x228   : > { %v783_v16 = vsel %vm776_vm4, %v3143_v15, 0.0 }
 0x229   : > { %784 = vadd.xlane.f32.xlu0 %v783_v16 }
 0x23f   : > { %871 = vrot.lane.b32.xlu0 %v861_v21, %s3411_s29 }
 0x2b6   : > { %v785_v18 = vpop.xlane.xlu0 %784 }
 0x2b7   : > { %3144 = vrcp.f32 %v785_v18 }
 0x2ba   : > { %v872_v49 = vpop.permute.xlu0 %871 }
 0x2c1   : > { %v3145_v19 = vpop.eup %3144 }
 0x2c2   : > { %v787_v20 = vmul.f32 %v3145_v19, %v3143_v15 }
 0x2c4   : > { %2781 = vmatmul.mubr.msk.f32.vlgmr.msra.gmra.mrb[2].mxu0 %vm776_vm4, %v787_v20 }
 0x2c5   : > { %2826 = vmatprep.mubr.msk.f32.mxu0 %vm3407_vm2, %v3408_v5  ;;  %2945 = vmatpush3.bf16.msra.mxu0 %v2944_v11 }
 0x2c6   : > { %2946 = vmatprep.subr.bf16.mxu0 %v3406_v3  ;;  %v2684_v3 = vld [vmem:[%s4334_s28] ss:$0 sm:$0xff] }
 0x2c9   : > { %2948 = vmatpush3.bf16.msra.mxu0 %v2947_v13 }
 0x397   : > { %v857_v46 = vpop.f32.mrb[2].mxu0 }
 0x398   : > { %v2782_v47 = vpop.f32.mrb[3].mxu0  ;;  %867 = vrot.lane.b32.xlu1 %v857_v46, %s3412_s11 }
 0x40a   : > { %v868_v50 = vpop.permute.xlu1 %867 }
 0x40b   : > { %v874_v51 = vsel %vm695_vm0, %v864_v48, %v868_v50 }
 0x40c   : > { %v876_v52 = vsel %vm875_vm5, %v874_v51, %v872_v49 }
 0x40d   : > { %v878_v53 = vsel %vm877_vm6, %v876_v52, %v864_v48 }
 0x40e   : > { %2816 = vmatmul.mubr.f32.vlgmr.msra.gmra.mrb[0].mxu1 %v878_v53 }
 0x4e1   : > { %v968_v55 = vpop.f32.mrb[0].mxu1 }
 0x4e2   : > { %v969_v56 = vadd.f32 %v2682_v54, %v968_v55  ;;  %v2817_v57 = vpop.f32.mrb[1].mxu1 }
 0x4e4   : > { %v2683_v58 = vmul.f32 -1.442695, %v969_v56 }
 0x4e6   : > { %3146 = vpow2.f32 %v2683_v58 }
 0x4e7   : > { %3148 = vtanh.f32 %v969_v56 }
 0x4f0   : > { %v3147_v59 = vpop.eup %3146 }
 0x4f1   : > { %v981_v61 = vadd.f32 1.0, %v3147_v59  ;;  %v3149_v63 = vpop.eup %3148 }
 0x4f3   : > { %3150 = vrcp.f32 %v981_v61 }
 0x4fd   : > { %v3151_v0 = vpop.eup %3150 }
 0x4fe   : > { %v984_v1 = vsel %vm976_vm9, %v3149_v63, %v3151_v0 }
 0x4ff   : > { %987 = vrot.lane.b32.xlu1 %v984_v1, %s3411_s29  ;;  %v985_v5 = vmul.f32 %v984_v1, %v864_v48 }
 0x571   : > { %v988_v2 = vpop.permute.xlu1 %987 }
 0x572   : > { %v990_v4 = vmul.f32 %v988_v2, %v984_v1 }
 0x574   : > { %992 = vrot.lane.b32.xlu1 %v990_v4, %s3412_s11 }
 0x5e6   : > { %v993_v6 = vpop.permute.xlu1 %992 }
 0x5e7   : > { %v995_v7 = vadd.f32 %v993_v6, %v985_v5 }
 0x5e9   : > { %3152 = vtanh.f32 %v995_v7 }
 0x5f3   : > { %v3153_v14 = vpop.eup %3152 }
 0x5f4   : > { %998 = vrot.lane.b32.xlu1 %v3153_v14, %s3411_s29 }
 0x666   : > { %v999_v15 = vpop.permute.xlu1 %998 }
 0x667   : > { %v1001_v16 = vmul.f32 %v999_v15, %v984_v1 }
 0x669   : > { %1003 = vrot.lane.b32.xlu1 %v1001_v16, %s3412_s11 }
 0x66d   : > { %1008 = vrot.lane.b32.xlu1 %v995_v7, %s3410_s23 }
 0x6db   : > { %v1004_v17 = vpop.permute.xlu1 %1003 }
 0x6dc   : > { %1006 = vst.msk [vmem:[#allocation2] sm:$0xff] %vm695_vm0, %v1004_v17  ;;  %2827 = vmatmul.mubr.msk.f32.vlgmr.msra.gmra.mrb[4].mxu0 %vm695_vm0, %v1004_v17 }
 0x6df   : > { %v1009_v18 = vpop.permute.xlu1 %1008 }
 0x6e0   : > { %1011 = vst.msk [vmem:[#allocation3] sm:$0xff] %vm695_vm0, %v1009_v18 }
 0x7af   : > { %v1091_v19 = vpop.f32.mrb[4].mxu0 }
 0x7b0   : > { %v1092_v20 = vadd.f32 %v2684_v3, %v1091_v19  ;;  %v2828_v21 = vpop.f32.mrb[5].mxu0 }
 0x7b2   : > { %1095 = vst.msk [vmem:[#allocation4] sm:$0xff] %vm695_vm0, %v1092_v20 }
 0x7b3 PF: > { %v1122_v22 = vlaneseq  ;;  %v3413_v23 = vmov 1966171168   ;;  %v3414_v27 = vmov 0   ;;  %v1101_v38 = vld [vmem:[%s3733_s5] sm:$0xff]  ;;  %v1102_v39 = vld [vmem:[%s3733_s5 + $0x8] sm:$0xff]  ;;  %v1103_v49 = vld [vmem:[%s3733_s5 + $0x10] sm:$0xff] }
 0x7b4   : > { %v1120_v24 = vunpack.c.l.s4 %v3413_v23  ;;  %3154 = vset.pattern.permute.xlu0 %v3414_v27  ;;  %3155 = vset.pattern.permute.xlu1 %v3414_v27  ;;  %v1110_v40 = vld [vmem:[%s3733_s5 + $0x48] sm:$0xff]  ;;  %v1109_v43 = vld [vmem:[%s3733_s5 + $0x40] sm:$0xff]  ;;  %v1104_v55 = vld [vmem:[%s3733_s5 + $0x18] sm:$0xff]  ;;  %s4335_s30 = sld [smem:[#allocation40_spill]]  ;;  %vm1262_vm10 = vcmask 261120   ;;  %vm1365_vm11 = vcmask 130112  }
 0x7b5   : > { %v3858_v26 = vshrl.u32 %v1122_v22, 7  ;;  %v1105_v50 = vld [vmem:[%s3733_s5 + $0x20] sm:$0xff]  ;;  %v1106_v58 = vld [vmem:[%s3733_s5 + $0x28] sm:$0xff]  ;;  %v1111_v62 = vld [vmem:[%s3733_s5 + $0x50] sm:$0xff]  ;;  %vm1430_vm12 = vcmask 1041409   ;;  %vm1432_vm13 = vcmask 1042434  }
 0x7b6   : > { %v1121_v28 = vunpack.c.0.s8 %v1120_v24  ;;  %v1112_v0 = vld [vmem:[%s3733_s5 + $0x58] sm:$0xff]  ;;  %v1113_v5 = vld [vmem:[%s3733_s5 + $0x60] sm:$0xff]  ;;  %v1114_v8 = vld [vmem:[%s3733_s5 + $0x68] sm:$0xff]  ;;  %vm1434_vm14 = vcmask 1043459   ;;  %vm1436_vm15 = vcmask 1044484   ;;  %vm1438_vm0 = vcmask 1045509  }
 0x7b7   : > { %v3862_v32 = vsub.s32 0, %v3858_v26  ;;  %v1107_v15 = vld [vmem:[%s3733_s5 + $0x30] sm:$0xff]  ;;  %v1108_v21 = vld [vmem:[%s3733_s5 + $0x38] sm:$0xff]  ;;  %vm1440_vm1 = vcmask 1046534   ;;  %vm1442_vm2 = vcmask 1047559   ;;  %vm1445_vm3 = vcmask 130048  }
 0x7b8   : > { %v1124_v30 = vsub.s32 %v1121_v28, %v3858_v26  ;;  %vm1695_vm4 = vcmask 7168   ;;  %vm3416_vm5 = vmmov 0  }
 0x7b9   : > { %v1100_v25 = vld [vmem:[#allocation4] sm:$0xff] }
 0x7ba   : > { %v1118_v29 = vcombine.high %v1100_v25, %v1100_v25  ;;  %v1125_v31 = vrot.slane %v1100_v25, %v1124_v30  ;;  %v3884_v6 = vld [vmem:[%s4335_s30] ss:$0 sm:$0xff] }
 0x7bc   : > { %v1132_v33 = vrot.slane %v1118_v29, %v1124_v30  ;;  %v1141_v34 = vrot.slane %v1125_v31, %v1124_v30  ;;  %v1133_v36 = vcombine.high %v1125_v31, %v1125_v31 }
 0x7be   : > { %v1148_v35 = vrot.slane %v1132_v33, %v1124_v30  ;;  %v1134_v37 = vcombine.high %v1132_v33, %v1132_v33  ;;  %v1170_v41 = vrot.slane %v1141_v34, %v3862_v32  ;;  %v1155_v44 = vrot.slane %v1133_v36, %v1124_v30  ;;  %v1115_v33 = vld [vmem:[%s3733_s5 + $0x70] sm:$0xff] }
 0x7bf   : > { %v1163_v45 = vcombine.high %v1141_v34, %v1141_v34 }
 0x7c0   : > { %v1186_v42 = vrot.slane %v1148_v35, %v3862_v32  ;;  %v1207_v46 = vadd.f32 %v1170_v41, %v1101_v38  ;;  %v1208_v47 = vadd.f32 %v1170_v41, %v1102_v39  ;;  %v1162_v51 = vrot.slane %v1134_v37, %v1124_v30  ;;  %v1116_v38 = vld [vmem:[%s3733_s5 + $0x78] sm:$0xff] }
 0x7c1   : > { %v1174_v53 = vrot.slane %v1155_v44, %v3862_v32  ;;  %v1178_v54 = vrot.slane %v1163_v45, %v3862_v32  ;;  %v1164_v61 = vcombine.high %v1148_v35, %v1148_v35  ;;  %v1165_v4 = vcombine.high %v1155_v44, %v1155_v44 }
 0x7c2   : > { %v1216_v48 = vadd.f32 %v1186_v42, %v1110_v40  ;;  %v1215_v52 = vadd.f32 %v1186_v42, %v1109_v43  ;;  %3157 = vtanh.f32 %v1207_v46  ;;  %v1190_v60 = vrot.slane %v1162_v51, %v3862_v32 }
 0x7c3   : > { %3159 = vtanh.f32 %v1208_v47  ;;  %v1209_v56 = vadd.f32 %v1174_v53, %v1103_v49  ;;  %v1211_v57 = vadd.f32 %v1178_v54, %v1105_v50  ;;  %v1210_v59 = vadd.f32 %v1174_v53, %v1104_v55 }
 0x7c4   : > { %3161 = vtanh.f32 %v1216_v48  ;;  %v1212_v63 = vadd.f32 %v1178_v54, %v1106_v58  ;;  %v1217_v1 = vadd.f32 %v1190_v60, %v1111_v62  ;;  %v1194_v2 = vrot.slane %v1164_v61, %v3862_v32 }
 0x7c5   : > { %3163 = vtanh.f32 %v1215_v52  ;;  %v1218_v7 = vadd.f32 %v1190_v60, %v1112_v0  ;;  %v1182_v11 = vrot.slane %v1165_v4, %v3862_v32  ;;  %v1166_v12 = vcombine.high %v1162_v51, %v1162_v51 }
 0x7c6   : > { %3165 = vtanh.f32 %v1209_v56  ;;  %v1219_v10 = vadd.f32 %v1194_v2, %v1113_v5  ;;  %v1220_v18 = vadd.f32 %v1194_v2, %v1114_v8 }
 0x7c7   : > { %3167 = vtanh.f32 %v1211_v57  ;;  %v1213_v24 = vadd.f32 %v1182_v11, %v1107_v15  ;;  %v1198_v25 = vrot.slane %v1166_v12, %v3862_v32  ;;  %v1214_v35 = vadd.f32 %v1182_v11, %v1108_v21 }
 0x7c8   : > { %3169 = vtanh.f32 %v1210_v59 }
 0x7c9   : > { %3171 = vtanh.f32 %v1212_v63  ;;  %v1221_v40 = vadd.f32 %v1198_v25, %v1115_v33  ;;  %v1222_v44 = vadd.f32 %v1198_v25, %v1116_v38 }
 0x7ca   : > { %3173 = vtanh.f32 %v1217_v1 }
 0x7cb   : > { %3175 = vtanh.f32 %v1218_v7 }
 0x7cc   : > { %v3158_v9 = vpop.eup %3157  ;;  %3177 = vtanh.f32 %v1219_v10  ;;  %v2687_v10 = vld [vmem:[#allocation8] ss:$0 sm:$0xff] }
 0x7cd   : > { %v3160_v13 = vpop.eup %3159  ;;  %v1246_v14 = vmul.f32 %v3158_v9, %v3884_v6  ;;  %3179 = vtanh.f32 %v1220_v18 }
 0x7ce   : > { %v3162_v16 = vpop.eup %3161  ;;  %v1247_v17 = vmul.f32 %v3160_v13, %v3884_v6  ;;  %3181 = vtanh.f32 %v1213_v24 }
 0x7cf   : > { %v3164_v3 = vpop.eup %3163  ;;  %v1263_v19 = vsel %vm1262_vm10, %v1246_v14, 0.0  ;;  %v1255_v20 = vmul.f32 %v3162_v16, %v3884_v6  ;;  %3183 = vtanh.f32 %v1214_v35 }
 0x7d0   : > { %v3166_v23 = vpop.eup %3165  ;;  %1264 = vadd.xlane.f32.xlu0 %v1263_v19  ;;  %v1266_v28 = vsel %vm1262_vm10, %v1247_v17, 0.0  ;;  %v1254_v30 = vmul.f32 %v3164_v3, %v3884_v6  ;;  %3185 = vtanh.f32 %v1221_v40 }
 0x7d1   : > { %v3168_v27 = vpop.eup %3167  ;;  %v1290_v29 = vsel %vm1262_vm10, %v1255_v20, 0.0  ;;  %v1248_v31 = vmul.f32 %v3166_v23, %v3884_v6  ;;  %3187 = vtanh.f32 %v1222_v44  ;;  %v3926_v23 = vand.u32 127, %v1122_v22 }
 0x7d2   : > { %v3170_v34 = vpop.eup %3169  ;;  %1291 = vadd.xlane.f32.xlu1 %v1290_v29  ;;  %v1287_v41 = vsel %vm1262_vm10, %v1254_v30, 0.0  ;;  %v1250_v42 = vmul.f32 %v3168_v27, %v3884_v6 }
 0x7d3   : > { %v1269_v36 = vsel %vm1262_vm10, %v1248_v31, 0.0  ;;  %v1249_v37 = vmul.f32 %v3170_v34, %v3884_v6  ;;  %v3172_v39 = vpop.eup %3171  ;;  %v1360_v24 = vadd.s32 4294967288, %v3926_v23 }
 0x7d4   : > { %1267 = vadd.xlane.f32.xlu0 %v1266_v28  ;;  %v3174_v43 = vpop.eup %3173  ;;  %v1251_v46 = vmul.f32 %v3172_v39, %v3884_v6  ;;  %v1275_v48 = vsel %vm1262_vm10, %v1250_v42, 0.0  ;;  %v3931_v28 = vsub.s32 %v3926_v23, %v3858_v26 }
 0x7d5   : > { %v1272_v45 = vsel %vm1262_vm10, %v1249_v37, 0.0  ;;  %v3176_v47 = vpop.eup %3175  ;;  %v1256_v49 = vmul.f32 %v3174_v43, %v3884_v6  ;;  %v3934_v29 = vsub.s32 %v1360_v24, %v3858_v26  ;;  %v1463_v24 = vsub.s32 1, %v3858_v26 }
 0x7d6   : > { %1270 = vadd.xlane.f32.xlu1 %v1269_v36  ;;  %v3178_v50 = vpop.eup %3177  ;;  %v1278_v51 = vsel %vm1262_vm10, %v1251_v46, 0.0  ;;  %v1257_v52 = vmul.f32 %v3176_v47, %v3884_v6 }
 0x7d7   : > { %v3180_v53 = vpop.eup %3179  ;;  %v1293_v54 = vsel %vm1262_vm10, %v1256_v49, 0.0  ;;  %v1258_v55 = vmul.f32 %v3178_v50, %v3884_v6 }
 0x7d8   : > { %1288 = vadd.xlane.f32.xlu0 %v1287_v41  ;;  %v3182_v56 = vpop.eup %3181  ;;  %v1296_v57 = vsel %vm1262_vm10, %v1257_v52, 0.0  ;;  %v1259_v58 = vmul.f32 %v3180_v53, %v3884_v6 }
 0x7d9   : > { %v3184_v59 = vpop.eup %3183  ;;  %v1299_v60 = vsel %vm1262_vm10, %v1258_v55, 0.0  ;;  %v1252_v61 = vmul.f32 %v3182_v56, %v3884_v6 }
 0x7da   : > { %1273 = vadd.xlane.f32.xlu1 %v1272_v45  ;;  %v3186_v62 = vpop.eup %3185  ;;  %v1302_v63 = vsel %vm1262_vm10, %v1259_v58, 0.0  ;;  %v1253_v0 = vmul.f32 %v3184_v59, %v3884_v6 }
 0x7db   : > { %v3188_v1 = vpop.eup %3187  ;;  %v1281_v2 = vsel %vm1262_vm10, %v1252_v61, 0.0  ;;  %v1260_v4 = vmul.f32 %v3186_v62, %v3884_v6 }
 0x7dc   : > { %1276 = vadd.xlane.f32.xlu0 %v1275_v48  ;;  %v1284_v5 = vsel %vm1262_vm10, %v1253_v0, 0.0  ;;  %v1261_v7 = vmul.f32 %v3188_v1, %v3884_v6 }
 0x7dd   : > { %v1305_v8 = vsel %vm1262_vm10, %v1260_v4, 0.0 }
 0x7de   : > { %1279 = vadd.xlane.f32.xlu1 %v1278_v51  ;;  %v1308_v9 = vsel %vm1262_vm10, %v1261_v7, 0.0 }
 0x7e0   : > { %1294 = vadd.xlane.f32.xlu0 %v1293_v54 }
 0x7e2   : > { %1297 = vadd.xlane.f32.xlu1 %v1296_v57 }
 0x7e4   : > { %1300 = vadd.xlane.f32.xlu0 %v1299_v60 }
 0x7e6   : > { %1303 = vadd.xlane.f32.xlu1 %v1302_v63 }
 0x7e8   : > { %1282 = vadd.xlane.f32.xlu0 %v1281_v2 }
 0x7ea   : > { %1285 = vadd.xlane.f32.xlu1 %v1284_v5 }
 0x7ec   : > { %1306 = vadd.xlane.f32.xlu0 %v1305_v8 }
 0x7ee   : > { %1309 = vadd.xlane.f32.xlu1 %v1308_v9 }
 0x802   : > { %1318 = vperm.xlu0 %3154, %v2687_v10  }
 0x85d   : > { %v1265_v11 = vpop.xlane.xlu0 %1264 }
 0x85f   : > { %v1292_v12 = vpop.xlane.xlu1 %1291 }
 0x861   : > { %v1268_v13 = vpop.xlane.xlu0 %1267 }
 0x863   : > { %v1271_v14 = vpop.xlane.xlu1 %1270 }
 0x865   : > { %v1289_v15 = vpop.xlane.xlu0 %1288 }
 0x867   : > { %v1274_v16 = vpop.xlane.xlu1 %1273 }
 0x869   : > { %v1277_v17 = vpop.xlane.xlu0 %1276 }
 0x86b   : > { %v1280_v18 = vpop.xlane.xlu1 %1279 }
 0x86d   : > { %v1295_v3 = vpop.xlane.xlu0 %1294 }
 0x86f   : > { %v1298_v19 = vpop.xlane.xlu1 %1297 }
 0x871   : > { %v1301_v6 = vpop.xlane.xlu0 %1300 }
 0x873   : > { %v1304_v21 = vpop.xlane.xlu1 %1303 }
 0x875   : > { %v1283_v20 = vpop.xlane.xlu0 %1282 }
 0x877   : > { %v1286_v27 = vpop.xlane.xlu1 %1285 }
 0x879   : > { %v1307_v25 = vpop.xlane.xlu0 %1306 }
 0x87b   : > { %v1310_v37 = vpop.xlane.xlu1 %1309 }
 0x881   : > { %v1319_v30 = vpop.permute.xlu0 %1318 }
 0x882   : > { %v3936_v31 = vadd.f32 %v1319_v30, %v1265_v11  ;;  %v3938_v33 = vadd.f32 %v1319_v30, %v1268_v13  ;;  %v3940_v34 = vadd.f32 %v1319_v30, %v1271_v14  ;;  %v3942_v22 = vadd.f32 %v1319_v30, %v1274_v16 }
 0x883   : > { %v3944_v35 = vadd.f32 %v1319_v30, %v1277_v17  ;;  %v3946_v36 = vadd.f32 %v1319_v30, %v1280_v18  ;;  %v3948_v38 = vadd.f32 %v1319_v30, %v1283_v20  ;;  %v3950_v39 = vadd.f32 %v1319_v30, %v1286_v27  ;;  %v4016_v18 = vld [vmem:[#allocation5] sm:$0xff] }
 0x884   : > { %v3952_v40 = vadd.f32 %v1319_v30, %v1289_v15  ;;  %v3954_v41 = vadd.f32 %v1319_v30, %v1292_v12  ;;  %v3956_v42 = vadd.f32 %v1319_v30, %v1295_v3  ;;  %v3958_v43 = vadd.f32 %v1319_v30, %v1298_v19 }
 0x885   : > { %v3960_v44 = vadd.f32 %v1319_v30, %v1301_v6  ;;  %v3962_v45 = vadd.f32 %v1319_v30, %v1304_v21  ;;  %v1359_v46 = vrot.slane %v3936_v31, %v3931_v28  ;;  %v1364_v47 = vrot.slane %v3938_v33, %v3934_v29 }
 0x886   : > { %v1370_v48 = vrot.slane %v3940_v34, %v3931_v28  ;;  %v1374_v49 = vrot.slane %v3942_v22, %v3934_v29  ;;  %v3972_v50 = vadd.f32 %v1319_v30, %v1307_v25  ;;  %v3974_v51 = vadd.f32 %v1319_v30, %v1310_v37 }
 0x887   : > { %v1379_v52 = vrot.slane %v3944_v35, %v3931_v28  ;;  %v1383_v53 = vrot.slane %v3946_v36, %v3934_v29  ;;  %v1366_v54 = vsel %vm1365_vm11, %v1364_v47, %v1359_v46  ;;  %v1388_v56 = vrot.slane %v3948_v38, %v3931_v28 }
 0x888   : > { %v1375_v55 = vsel %vm1365_vm11, %v1374_v49, %v1370_v48  ;;  %v1392_v57 = vrot.slane %v3950_v39, %v3934_v29  ;;  %v1397_v59 = vrot.slane %v3952_v40, %v3931_v28  ;;  %v1401_v60 = vrot.slane %v3954_v41, %v3934_v29 }
 0x889   : > { %v1384_v58 = vsel %vm1365_vm11, %v1383_v53, %v1379_v52  ;;  %v1406_v61 = vrot.slane %v3956_v42, %v3931_v28  ;;  %v1410_v62 = vrot.slane %v3958_v43, %v3934_v29  ;;  %v1415_v63 = vrot.slane %v3960_v44, %v3931_v28 }
 0x88a   : > { %v1419_v0 = vrot.slane %v3962_v45, %v3934_v29  ;;  %v1431_v1 = vsel %vm1430_vm12, %v1375_v55, %v1366_v54  ;;  %v1393_v2 = vsel %vm1365_vm11, %v1392_v57, %v1388_v56  ;;  %v1424_v4 = vrot.slane %v3972_v50, %v3931_v28 }
 0x88b   : > { %v1428_v5 = vrot.slane %v3974_v51, %v3934_v29  ;;  %v1433_v7 = vsel %vm1432_vm13, %v1384_v58, %v1431_v1  ;;  %v1402_v8 = vsel %vm1365_vm11, %v1401_v60, %v1397_v59  ;;  %v1411_v10 = vsel %vm1365_vm11, %v1410_v62, %v1406_v61 }
 0x88c   : > { %v1435_v9 = vsel %vm1434_vm14, %v1393_v2, %v1433_v7  ;;  %v1420_v12 = vsel %vm1365_vm11, %v1419_v0, %v1415_v63  ;;  %v1471_v20 = vsub.s32 3, %v3858_v26  ;;  %v1475_v27 = vsub.s32 4, %v3858_v26 }
 0x88d   : > { %v1437_v11 = vsel %vm1436_vm15, %v1402_v8, %v1435_v9  ;;  %v1429_v14 = vsel %vm1365_vm11, %v1428_v5, %v1424_v4  ;;  %v1479_v48 = vsub.s32 5, %v3858_v26  ;;  %v1467_v54 = vsub.s32 2, %v3858_v26 }
 0x88e   : > { %v1439_v13 = vsel %vm1438_vm0, %v1411_v10, %v1437_v11  ;;  %v1483_v56 = vsub.s32 6, %v3858_v26  ;;  %v1487_v60 = vsub.s32 7, %v3858_v26  ;;  %v3415_v10 = vmov 0.0|0.0  }
 0x88f   : > { %v1441_v15 = vsel %vm1440_vm1, %v1420_v12, %v1439_v13  ;;  %2949 = vmatprep.subr.bf16.mxu0 %v3415_v10  ;;  %2952 = vmatprep.subr.bf16.mxu1 %v3415_v10  ;;  %v1697_v12 = vld [vmem:[%s3727_s14] sm:$0xff]  ;;  %v1698_v13 = vld [vmem:[%s3727_s14 + $0x8] sm:$0xff] }
 0x890   : > { %v1443_v16 = vsel %vm1442_vm2, %v1429_v14, %v1441_v15  ;;  %v2950_v15 = vpack.c.bf16 %v1698_v13, %v1697_v12  ;;  %v1709_v12 = vld [vmem:[%s3727_s14 + $0x60] sm:$0xff]  ;;  %v1710_v13 = vld [vmem:[%s3727_s14 + $0x68] sm:$0xff] }
 0x891   : > { %v1446_v17 = vsel %vm1445_vm3, %v1443_v16, -inf  ;;  %v3417_v16 = vmov 0.0  }
 0x892   : > { %1447 = vmax.xlane.f32.xlu1 %v1446_v17  ;;  %2833 = vmatprep.mubr.msk.f32.mxu0 %vm3416_vm5, %v3417_v16 }
 0x893   : > { %2840 = vmatprep.mubr.msk.f32.mxu1 %vm3416_vm5, %v3417_v16  ;;  %2951 = vmatpush3.bf16.msra.mxu0 %v2950_v15 }
 0x894   : > { %2955 = vmatprep.subr.bf16.mxu0 %v3415_v10 }
 0x91f   : > { %v1448_v3 = vpop.xlane.xlu1 %1447 }
 0x920   : > { %v4019_v6 = vmax.f32 %v4016_v18, %v1448_v3 }
 0x922   : > { %v1450_v19 = vsub.f32 %v4016_v18, %v4019_v6  ;;  %2321 = vst.msk [vmem:[#allocation5] sm:$0xff] %vm1695_vm4, %v4019_v6  ;;  %1455 = vperm.xlu1 %3155, %v4019_v6  }
 0x9a1   : > { %v1456_v21 = vpop.permute.xlu1 %1455 }
 0x9a2   : > { %v1460_v25 = vrot.slane %v1456_v21, %v3862_v32  ;;  %v1472_v30 = vrot.slane %v1456_v21, %v1471_v20  ;;  %v1464_v46 = vrot.slane %v1456_v21, %v1463_v24  ;;  %v4033_v49 = vrot.slane %v1456_v21, %v1475_v27  ;;  %v1699_v27 = vld [vmem:[%s3727_s14 + $0x10] sm:$0xff] }
 0x9a3   : > { %v4039_v57 = vrot.slane %v1456_v21, %v1479_v48  ;;  %v1468_v58 = vrot.slane %v1456_v21, %v1467_v54  ;;  %v4045_v61 = vrot.slane %v1456_v21, %v1483_v56  ;;  %v4050_v1 = vrot.slane %v1456_v21, %v1487_v60  ;;  %v1704_v60 = vld [vmem:[%s3727_s14 + $0x38] sm:$0xff] }
 0x9a4   : > { %v1497_v37 = vsub.f32 %v3936_v31, %v1460_v25  ;;  %v1498_v47 = vsub.f32 %v3938_v33, %v1460_v25  ;;  %v1503_v52 = vsub.f32 %v3948_v38, %v1472_v30  ;;  %v1499_v55 = vsub.f32 %v3940_v34, %v1464_v46 }
 0x9a5   : > { %v1505_v31 = vsub.f32 %v3952_v40, %v4033_v49  ;;  %v1500_v59 = vsub.f32 %v3942_v22, %v1464_v46  ;;  %v1507_v34 = vsub.f32 %v3956_v42, %v4039_v57  ;;  %v1501_v63 = vsub.f32 %v3944_v35, %v1468_v58 }
 0x9a6   : > { %v1513_v53 = vmul.f32 1.442695, %v1497_v37  ;;  %v1515_v32 = vmul.f32 1.442695, %v1498_v47  ;;  %v1525_v33 = vmul.f32 1.442695, %v1503_v52  ;;  %v1509_v22 = vsub.f32 %v3960_v44, %v4045_v61 }
 0x9a7   : > { %v1517_v38 = vmul.f32 1.442695, %v1499_v55  ;;  %v1529_v62 = vmul.f32 1.442695, %v1505_v31  ;;  %v1519_v0 = vmul.f32 1.442695, %v1500_v59  ;;  %v1502_v26 = vsub.f32 %v3946_v36, %v1468_v58 }
 0x9a8   : > { %3189 = vpow2.f32 %v1513_v53  ;;  %v1533_v2 = vmul.f32 1.442695, %v1507_v34  ;;  %v1521_v4 = vmul.f32 1.442695, %v1501_v63  ;;  %v1511_v5 = vsub.f32 %v3972_v50, %v4050_v1  ;;  %v1702_v31 = vld [vmem:[%s3727_s14 + $0x28] sm:$0xff] }
 0x9a9   : > { %3191 = vpow2.f32 %v1515_v32  ;;  %v1537_v35 = vmul.f32 1.442695, %v1509_v22  ;;  %v1504_v8 = vsub.f32 %v3950_v39, %v1472_v30  ;;  %v1523_v44 = vmul.f32 1.442695, %v1502_v26  ;;  %v1700_v30 = vld [vmem:[%s3727_s14 + $0x18] sm:$0xff]  ;;  %v1705_v22 = vld [vmem:[%s3727_s14 + $0x40] sm:$0xff] }
 0x9aa   : > { %3193 = vpow2.f32 %v1525_v33  ;;  %v1541_v36 = vmul.f32 1.442695, %v1511_v5  ;;  %v1506_v11 = vsub.f32 %v3954_v41, %v4033_v49  ;;  %v1508_v17 = vsub.f32 %v3958_v43, %v4039_v57  ;;  %v1701_v57 = vld [vmem:[%s3727_s14 + $0x20] sm:$0xff] }
 0x9ab   : > { %3195 = vpow2.f32 %v1517_v38  ;;  %v1527_v39 = vmul.f32 1.442695, %v1504_v8  ;;  %v1510_v24 = vsub.f32 %v3962_v45, %v4045_v61  ;;  %v2953_v46 = vpack.c.bf16 %v1700_v30, %v1699_v27  ;;  %v1703_v38 = vld [vmem:[%s3727_s14 + $0x30] sm:$0xff]  ;;  %v1708_v8 = vld [vmem:[%s3727_s14 + $0x58] sm:$0xff] }
 0x9ac   : > { %3197 = vpow2.f32 %v1529_v62  ;;  %v1531_v3 = vmul.f32 1.442695, %v1506_v11  ;;  %v1535_v25 = vmul.f32 1.442695, %v1508_v17  ;;  %v1512_v47 = vsub.f32 %v3974_v51, %v4050_v1 }
 0x9ad   : > { %3199 = vpow2.f32 %v1519_v0  ;;  %v1539_v48 = vmul.f32 1.442695, %v1510_v24  ;;  %2954 = vmatpush3.bf16.msra.mxu1 %v2953_v46  ;;  %v1451_v53 = vmul.f32 1.442695, %v1450_v19  ;;  %v2956_v19 = vpack.c.bf16 %v1702_v31, %v1701_v57 }
 0x9ae   : > { %3201 = vpow2.f32 %v1533_v2  ;;  %2958 = vmatprep.subr.bf16.mxu1 %v3415_v10  ;;  %v1543_v45 = vmul.f32 1.442695, %v1512_v47  ;;  %v2959_v63 = vpack.c.bf16 %v1704_v60, %v1703_v38  ;;  %v1706_v2 = vld [vmem:[%s3727_s14 + $0x48] sm:$0xff] }
 0x9af   : > { %3203 = vpow2.f32 %v1521_v4 }
 0x9b0   : > { %3205 = vpow2.f32 %v1537_v35  ;;  %v2962_v35 = vpack.c.bf16 %v1706_v2, %v1705_v22 }
 0x9b1   : > { %3207 = vpow2.f32 %v1523_v44 }
 0x9b2   : > { %v3190_v40 = vpop.eup %3189  ;;  %3209 = vpow2.f32 %v1541_v36 }
 0x9b3   : > { %1564 = vperm.xlu1 %3155, %v3190_v40   ;;  %v3192_v42 = vpop.eup %3191  ;;  %3211 = vpow2.f32 %v1527_v39 }
 0x9b4   : > { %v3194_v7 = vpop.eup %3193  ;;  %3213 = vpow2.f32 %v1531_v3  ;;  %v2968_v3 = vpack.c.bf16 %v1710_v13, %v1709_v12 }
 0x9b5   : > { %1582 = vperm.xlu0 %3154, %v3194_v7   ;;  %v3196_v9 = vpop.eup %3195  ;;  %3215 = vpow2.f32 %v1535_v25  ;;  %v1707_v7 = vld [vmem:[%s3727_s14 + $0x50] sm:$0xff] }
 0x9b6   : > { %v3198_v50 = vpop.eup %3197  ;;  %3217 = vpow2.f32 %v1539_v48  ;;  %v2965_v11 = vpack.c.bf16 %v1708_v8, %v1707_v7 }
 0x9b7   : > { %1567 = vperm.xlu1 %3155, %v3192_v42   ;;  %v3200_v14 = vpop.eup %3199  ;;  %3219 = vpow2.f32 %v1543_v45 }
 0x9b8   : > { %v3202_v41 = vpop.eup %3201  ;;  %3221 = vpow2.f32 %v1451_v53 }
 0x9b9   : > { %1588 = vperm.xlu0 %3154, %v3198_v50   ;;  %v3204_v20 = vpop.eup %3203 }
 0x9ba   : > { %v3206_v21 = vpop.eup %3205 }
 0x9bb   : > { %1570 = vperm.xlu1 %3155, %v3196_v9   ;;  %v3208_v37 = vpop.eup %3207 }
 0x9bc   : > { %v3210_v43 = vpop.eup %3209 }
 0x9bd   : > { %1594 = vperm.xlu0 %3154, %v3202_v41   ;;  %v3212_v49 = vpop.eup %3211 }
 0x9be   : > { %v3214_v52 = vpop.eup %3213 }
 0x9bf   : > { %1573 = vperm.xlu1 %3155, %v3200_v14   ;;  %v3216_v51 = vpop.eup %3215 }
 0x9c0   : > { %v3218_v54 = vpop.eup %3217 }
 0x9c1   : > { %1600 = vperm.xlu0 %3154, %v3206_v21   ;;  %v3220_v55 = vpop.eup %3219  ;;  %v1712_v21 = vld [vmem:[%s3727_s14 + $0x78] sm:$0xff] }
 0x9c2   : > { %v4081_v32 = vpop.eup %3221 }
 0x9c3   : > { %1576 = vperm.xlu1 %3155, %v3204_v20   ;;  %v1711_v20 = vld [vmem:[%s3727_s14 + $0x70] sm:$0xff]  ;;  %s4336_s14 = sld [smem:[#allocation25_spill]] }
 0x9c4   : > { %v2971_v46 = vpack.c.bf16 %v1712_v21, %v1711_v20 }
 0x9c5   : > { %1606 = vperm.xlu0 %3154, %v3210_v43  }
 0x9c7   : > { %1579 = vperm.xlu1 %3155, %v3208_v37  }
 0x9c9   : > { %p2696_p13 = scmp.ne.s32.totalorder %s4336_s14, 1 }
 0x9ca   : > { %s3419_s5 = smov (!%p2696_p13), 32   ;;  %s4337_s7 = sld [smem:[#allocation36_spill]] (!%p2696_p13)  ;;  %vm3421_vm6 = vmmov (!%p2696_p13), 0   ;;  %vm2347_vm7 = vcmask (!%p2696_p13), 523264   ;;  %vm2368_vm8 = vcmask (!%p2696_p13), 785408   ;;  %vm2442_vm9 = vcmp.ge.s32.totalorder (!%p2696_p13), %v3926_v23, 64 }
 0x9cb   : > { %1585 = vperm.xlu1 %3155, %v3212_v49   ;;  %s3423_s21 = smov (!%p2696_p13), 64   ;;  %s4338_s28 = sld [smem:[#allocation37_spill]] (!%p2696_p13) }
 0x9cf   : > { %1591 = vperm.xlu1 %3155, %v3214_v52  }
 0x9d3   : > { %1597 = vperm.xlu1 %3155, %v3216_v51  }
 0x9d7   : > { %1603 = vperm.xlu1 %3155, %v3218_v54  }
 0x9db   : > { %1609 = vperm.xlu1 %3155, %v3220_v55  }
 0x9df   : > { %2292 = vperm.xlu1 %3155, %v4081_v32  }
 0xa32   : > { %v1565_v56 = vpop.permute.xlu1 %1564 }
 0xa33   : > { %v1614_v18 = vrot.slane %v1565_v56, %v3931_v28 }
 0xa34   : > { %v1583_v0 = vpop.permute.xlu0 %1582 }
 0xa35   : > { %v1641_v36 = vrot.slane %v1583_v0, %v3931_v28 }
 0xa36   : > { %v1568_v33 = vpop.permute.xlu1 %1567 }
 0xa37   : > { %v1618_v6 = vrot.slane %v1568_v33, %v3934_v29 }
 0xa38   : > { %v1589_v26 = vpop.permute.xlu0 %1588 }
 0xa39   : > { %v4089_v58 = vsel %vm1365_vm11, %v1618_v6, %v1614_v18  ;;  %v1650_v41 = vrot.slane %v1589_v26, %v3931_v28 }
 0xa3a   : > { %2834 = vmatmul.mubr.msk.f32.vlgmr.msra.gmra.mrb[0].mxu0 %vm1445_vm3, %v4089_v58  ;;  %v1571_v59 = vpop.permute.xlu1 %1570 }
 0xa3b   : > { %2957 = vmatpush3.bf16.msra.mxu0 %v2956_v19  ;;  %2847 = vmatprep.mubr.msk.f32.mxu0 %vm3416_vm5, %v3417_v16  ;;  %v1623_v34 = vrot.slane %v1571_v59, %v3931_v28  ;;  %v1545_v19 = vld [vmem:[#allocation6] sm:$0xff] }
 0xa3c   : > { %2961 = vmatprep.subr.bf16.mxu0 %v3415_v10  ;;  %v1595_v39 = vpop.permute.xlu0 %1594 }
 0xa3d   : > { %v1659_v30 = vrot.slane %v1595_v39, %v3931_v28  ;;  %v2289_v39 = vld [vmem:[#allocation7] sm:$0xff] }
 0xa3e   : > { %v1574_v61 = vpop.permute.xlu1 %1573 }
 0xa3f   : > { %v1627_v62 = vrot.slane %v1574_v61, %v3934_v29 }
 0xa40   : > { %v1601_v25 = vpop.permute.xlu0 %1600 }
 0xa41   : > { %v1628_v40 = vsel %vm1365_vm11, %v1627_v62, %v1623_v34  ;;  %v1668_v47 = vrot.slane %v1601_v25, %v3931_v28  ;;  %v3418_v25 = vmov (!%p2696_p13), 0  }
 0xa42   : > { %2841 = vmatmul.mubr.msk.f32.vlgmr.msra.gmra.mrb[0].mxu1 %vm1445_vm3, %v1628_v40  ;;  %v1577_v1 = vpop.permute.xlu1 %1576  ;;  %v1683_v45 = vsel %vm1430_vm12, %v1628_v40, %v4089_v58  ;;  %3223 = vset.pattern.permute.xlu0 (!%p2696_p13), %v3418_v25 }
 0xa43   : > { %2960 = vmatpush3.bf16.msra.mxu1 %v2959_v63  ;;  %2854 = vmatprep.mubr.msk.f32.mxu1 %vm3416_vm5, %v3417_v16  ;;  %v1632_v42 = vrot.slane %v1577_v1, %v3931_v28 }
 0xa44   : > { %2964 = vmatprep.subr.bf16.mxu1 %v3415_v10  ;;  %v1607_v49 = vpop.permute.xlu0 %1606 }
 0xa45   : > { %v1677_v55 = vrot.slane %v1607_v49, %v3931_v28  ;;  %v1546_v28 = vmul.f32 %v4081_v32, %v1545_v19  ;;  %v2354_v49 = vld [vmem:[%s4337_s7 + $0x28] sm:$0xff] (!%p2696_p13) }
 0xa46   : > { %v1580_v4 = vpop.permute.xlu1 %1579 }
 0xa47   : > { %v1636_v5 = vrot.slane %v1580_v4, %v3934_v29 }
 0xa49   : > { %v1637_v44 = vsel %vm1365_vm11, %v1636_v5, %v1632_v42 }
 0xa4a   : > { %2848 = vmatmul.mubr.msk.f32.vlgmr.msra.gmra.mrb[2].mxu0 %vm1445_vm3, %v1637_v44  ;;  %v1586_v9 = vpop.permute.xlu1 %1585  ;;  %v1684_v52 = vsel %vm1432_vm13, %v1637_v44, %v1683_v45 }
 0xa4b   : > { %v1645_v50 = vrot.slane %v1586_v9, %v3934_v29  ;;  %2963 = vmatpush3.bf16.msra.mxu0 %v2962_v35  ;;  %2861 = vmatprep.mubr.msk.f32.mxu0 %vm3416_vm5, %v3417_v16 }
 0xa4c   : > { %2967 = vmatprep.subr.bf16.mxu0 %v3415_v10 }
 0xa4d   : > { %v1646_v14 = vsel %vm1365_vm11, %v1645_v50, %v1641_v36 }
 0xa4e   : > { %2855 = vmatmul.mubr.msk.f32.vlgmr.msra.gmra.mrb[2].mxu1 %vm1445_vm3, %v1646_v14  ;;  %v1592_v15 = vpop.permute.xlu1 %1591  ;;  %v1685_v51 = vsel %vm1434_vm14, %v1646_v14, %v1684_v52  ;;  %v2355_v52 = vld [vmem:[%s4337_s7 + $0x30] sm:$0xff] (!%p2696_p13) }
 0xa4f   : > { %v1654_v17 = vrot.slane %v1592_v15, %v3934_v29  ;;  %2966 = vmatpush3.bf16.msra.mxu1 %v2965_v11  ;;  %2868 = vmatprep.mubr.msk.f32.mxu1 %vm3416_vm5, %v3417_v16 }
 0xa50   : > { %2970 = vmatprep.subr.bf16.mxu1 %v3415_v10 }
 0xa51   : > { %v1655_v24 = vsel %vm1365_vm11, %v1654_v17, %v1650_v41 }
 0xa52   : > { %2862 = vmatmul.mubr.msk.f32.vlgmr.msra.gmra.mrb[4].mxu0 %vm1445_vm3, %v1655_v24  ;;  %v1598_v27 = vpop.permute.xlu1 %1597  ;;  %v1686_v56 = vsel %vm1436_vm15, %v1655_v24, %v1685_v51  ;;  %v2326_v24 = vld [vmem:[%s3751_s6] sm:$0xff] (!%p2696_p13) }
 0xa53   : > { %v1663_v37 = vrot.slane %v1598_v27, %v3934_v29  ;;  %2969 = vmatpush3.bf16.msra.mxu0 %v2968_v3  ;;  %2875 = vmatprep.mubr.msk.f32.mxu0 %vm3416_vm5, %v3417_v16  ;;  %v2349_v27 = vld [vmem:[%s4337_s7] sm:$0xff] (!%p2696_p13) }
 0xa54   : > { %2343 = vrot.lane.b32.xlu1 (!%p2696_p13), %v2326_v24, %s3419_s5 }
 0xa55   : > { %v1664_v43 = vsel %vm1365_vm11, %v1663_v37, %v1659_v30  ;;  %v2350_v30 = vld [vmem:[%s4337_s7 + $0x8] sm:$0xff] (!%p2696_p13)  ;;  %v2351_v37 = vld [vmem:[%s4337_s7 + $0x10] sm:$0xff] (!%p2696_p13) }
 0xa56   : > { %2869 = vmatmul.mubr.msk.f32.vlgmr.msra.gmra.mrb[4].mxu1 %vm1445_vm3, %v1664_v43  ;;  %v1604_v10 = vpop.permute.xlu1 %1603 }
 0xa57   : > { %v1672_v48 = vrot.slane %v1604_v10, %v3934_v29  ;;  %2972 = vmatpush3.bf16.msra.mxu1 %v2971_v46  ;;  %2882 = vmatprep.mubr.msk.f32.mxu1 %vm3416_vm5, %v3417_v16  ;;  %v1687_v16 = vsel %vm1438_vm0, %v1664_v43, %v1686_v56  ;;  %v3420_v46 = vmov (!%p2696_p13), 0.0|0.0   ;;  %v2974_v43 = vpack.c.bf16 (!%p2696_p13), %v2350_v30, %v2349_v27  ;;  %v2352_v10 = vld [vmem:[%s4337_s7 + $0x18] sm:$0xff] (!%p2696_p13)  ;;  %v2357_v56 = vld [vmem:[%s4337_s7 + $0x40] sm:$0xff] (!%p2696_p13) }
 0xa58   : > { %2973 = vmatprep.subr.bf16.mxu0 (!%p2696_p13), %v3420_v46 }
 0xa59   : > { %v1673_v53 = vsel %vm1365_vm11, %v1672_v48, %v1668_v47  ;;  %v2977_v47 = vpack.c.bf16 (!%p2696_p13), %v2352_v10, %v2351_v37  ;;  %v2353_v48 = vld [vmem:[%s4337_s7 + $0x20] sm:$0xff] (!%p2696_p13) }
 0xa5a   : > { %2876 = vmatmul.mubr.msk.f32.vlgmr.msra.gmra.mrb[6].mxu0 %vm1445_vm3, %v1673_v53  ;;  %v1610_v54 = vpop.permute.xlu1 %1609  ;;  %v1688_v33 = vsel %vm1440_vm1, %v1673_v53, %v1687_v16  ;;  %v2980_v45 = vpack.c.bf16 (!%p2696_p13), %v2354_v49, %v2353_v48  ;;  %v2356_v53 = vld [vmem:[%s4337_s7 + $0x38] sm:$0xff] (!%p2696_p13) }
 0xa5b   : > { %v1681_v57 = vrot.slane %v1610_v54, %v3934_v29  ;;  %2975 = vmatpush3.bf16.msra.mxu0 (!%p2696_p13), %v2974_v43  ;;  %v2983_v54 = vpack.c.bf16 (!%p2696_p13), %v2356_v53, %v2355_v52 }
 0xa5c   : > { %2976 = vmatprep.subr.bf16.mxu0 (!%p2696_p13), %v3420_v46 }
 0xa5d   : > { %v1682_v31 = vsel %vm1365_vm11, %v1681_v57, %v1677_v55  ;;  %v4193_v55 = vld [vmem:[#allocation2] sm:$0xff] (!%p2696_p13)  ;;  %v2358_v57 = vld [vmem:[%s4337_s7 + $0x48] sm:$0xff] (!%p2696_p13)  ;;  %vm2443_vm11 = vcmp.lt.s32.totalorder (!%p2696_p13), %v3926_v23, 96 }
 0xa5e   : > { %2883 = vmatmul.mubr.msk.f32.vlgmr.msra.gmra.mrb[6].mxu1 %vm1445_vm3, %v1682_v31  ;;  %v1689_v18 = vsel %vm1442_vm2, %v1682_v31, %v1688_v33  ;;  %v2293_v12 = vpop.permute.xlu1 %2292  ;;  %v2986_v16 = vpack.c.bf16 (!%p2696_p13), %v2358_v57, %v2357_v56  ;;  %v2359_v31 = vld [vmem:[%s4337_s7 + $0x50] sm:$0xff] (!%p2696_p13)  ;;  %v2360_v33 = vld [vmem:[%s4337_s7 + $0x58] sm:$0xff] (!%p2696_p13)  ;;  %v2328_v23 = vld [vmem:[#allocation3] sm:$0xff] (!%p2696_p13) }
 0xa5f   : > { %v1691_v6 = vsel %vm1445_vm3, %v1689_v18, 0.0  ;;  %v2295_v17 = vmul.f32 %v2293_v12, %v2289_v39  ;;  %2978 = vmatpush3.bf16.msra.mxu0 (!%p2696_p13), %v2977_v47  ;;  %v3422_v18 = vmov (!%p2696_p13), 0.0  }
 0xa60   : > { %1692 = vadd.xlane.f32.xlu0 %v1691_v6  ;;  %2979 = vmatprep.subr.bf16.mxu0 (!%p2696_p13), %v3420_v46  ;;  %v2989_v6 = vpack.c.bf16 (!%p2696_p13), %v2360_v33, %v2359_v31 }
 0xa61   : > { %2909 = vmatprep.mubr.msk.f32.mxu0 (!%p2696_p13), %vm3421_vm6, %v3422_v18 }
 0xa63   : > { %2981 = vmatpush3.bf16.msra.mxu0 (!%p2696_p13), %v2980_v45 }
 0xa64   : > { %2982 = vmatprep.subr.bf16.mxu0 (!%p2696_p13), %v3420_v46 }
 0xa67   : > { %2984 = vmatpush3.bf16.msra.mxu0 (!%p2696_p13), %v2983_v54 }
 0xa68   : > { %2985 = vmatprep.subr.bf16.mxu0 (!%p2696_p13), %v3420_v46 }
 0xa6b   : > { %2987 = vmatpush3.bf16.msra.mxu0 (!%p2696_p13), %v2986_v16 }
 0xa6c   : > { %2988 = vmatprep.subr.bf16.mxu0 (!%p2696_p13), %v3420_v46 }
 0xa6f   : > { %2990 = vmatpush3.bf16.msra.mxu0 (!%p2696_p13), %v2989_v6 }
 0xaed   : > { %v1693_v58 = vpop.xlane.xlu0 %1692 }
 0xaee   : > { %v1694_v59 = vadd.f32 %v1693_v58, %v1546_v28 }
 0xaf0   : > { %1696 = vst.msk [vmem:[#allocation6] sm:$0xff] %vm1695_vm4, %v1694_v59  ;;  %v2344_v59 = vpop.permute.xlu1 (!%p2696_p13), %2343 }
 0xaf7   : > { %v2330_v21 = vld [vmem:[#allocation6] sm:$0xff] (!%p2696_p13) }
 0xaf8   : > { %3224 = vrcp.f32 (!%p2696_p13), %v2330_v21 }
 0xb02   : > { %v3225_v51 = vpop.eup (!%p2696_p13), %3224 }
 0xb03   : > { %2334 = vperm.xlu0 (!%p2696_p13), %3223, %v3225_v51  }
 0xb07   : > { %2339 = vrot.lane.b32.xlu0 (!%p2696_p13), %v4193_v55, %s3419_s5 }
 0xb0b   : > { %2453 = vrot.lane.b32.xlu0 (!%p2696_p13), %v2326_v24, %s3423_s21 }
 0xb0d   : > { %v1781_v29 = vpop.f32.mrb[0].mxu0 }
 0xb0e   : > { %v2835_v38 = vpop.f32.mrb[1].mxu0 }
 0xb15   : > { %v1853_v60 = vpop.f32.mrb[0].mxu1 }
 0xb16   : > { %v2304_v61 = vrot.slane %v1853_v60, 7  ;;  %v2842_v34 = vpop.f32.mrb[1].mxu1 }
 0xb18   : > { %v2305_v62 = vsel %vm1430_vm12, %v2304_v61, %v1781_v29  ;;  %v2697_v61 = vld [vmem:[%s4338_s28] ss:$0 sm:$0xff] (!%p2696_p13)  ;;  %vm2444_vm12 = vmand (!%p2696_p13), %vm2442_vm9, %vm2443_vm11 }
 0xb1d   : > { %v1925_v63 = vpop.f32.mrb[2].mxu0 }
 0xb1e   : > { %v2306_v0 = vrot.slane %v1925_v63, 6  ;;  %v2849_v40 = vpop.f32.mrb[3].mxu0 }
 0xb20   : > { %v2307_v1 = vsel %vm1432_vm13, %v2306_v0, %v2305_v62 }
 0xb21   : > { %v1997_v22 = vpop.f32.mrb[2].mxu1 }
 0xb22   : > { %v2308_v2 = vrot.slane %v1997_v22, 5  ;;  %v2856_v26 = vpop.f32.mrb[3].mxu1 }
 0xb24   : > { %v2309_v32 = vsel %vm1434_vm14, %v2308_v2, %v2307_v1 }
 0xb25   : > { %v2069_v4 = vpop.f32.mrb[4].mxu0 }
 0xb26   : > { %v2310_v42 = vrot.slane %v2069_v4, 4  ;;  %v2863_v5 = vpop.f32.mrb[5].mxu0 }
 0xb28   : > { %v2311_v35 = vsel %vm1436_vm15, %v2310_v42, %v2309_v32 }
 0xb29   : > { %v2141_v7 = vpop.f32.mrb[4].mxu1 }
 0xb2a   : > { %v2312_v8 = vrot.slane %v2141_v7, 3  ;;  %v2870_v44 = vpop.f32.mrb[5].mxu1 }
 0xb2c   : > { %v2313_v9 = vsel %vm1438_vm0, %v2312_v8, %v2311_v35 }
 0xb2d   : > { %v2213_v36 = vpop.f32.mrb[6].mxu0 }
 0xb2e   : > { %v2314_v50 = vrot.slane %v2213_v36, 2  ;;  %v2877_v11 = vpop.f32.mrb[7].mxu0 }
 0xb30   : > { %v2315_v13 = vsel %vm1440_vm1, %v2314_v50, %v2313_v9 }
 0xb31   : > { %v2285_v14 = vpop.f32.mrb[6].mxu1  ;;  %2325 = sbr.rel (%p2696_p13) target bundleno = 3677 (0xe5d), region = 100 }
 0xb32   : > { %v2316_v15 = vrot.slane %v2285_v14, 1  ;;  %v2884_v41 = vpop.f32.mrb[7].mxu1 }
 0xb34   : > { %v2317_v3 = vsel %vm1442_vm2, %v2316_v15, %v2315_v13 }
 0xb35   : > { %v2319_v20 = vadd.f32 %v2317_v3, %v2295_v17 }
 0xb37   : > { %2320 = vst.msk [vmem:[#allocation7] sm:$0xff] %vm1262_vm10, %v2319_v20 }
 0xb3e   : > { %v2329_v28 = vld [vmem:[#allocation7] sm:$0xff] }
 0xb82   : > { %v2335_v19 = vpop.permute.xlu0 %2334 }
 0xb83   : > { %v2337_v58 = vmul.f32 %v2335_v19, %v2329_v28 }
 0xb86   : > { %v2340_v29 = vpop.permute.xlu0 %2339 }
 0xb87   : > { %v2346_v38 = vsel %vm1262_vm10, %v2337_v58, %v2340_v29 }
 0xb88   : > { %v2348_v60 = vsel %vm2347_vm7, %v2346_v38, %v2344_v59 }
 0xb89   : > { %2910 = vmatmul.mubr.msk.f32.vlgmr.msra.gmra.mrb[0].mxu0 %vm2368_vm8, %v2348_v60 }
 0xb8a   : > { %v2454_v42 = vpop.permute.xlu0 %2453 }
 0xc5c   : > { %v2438_v34 = vpop.f32.mrb[0].mxu0 }
 0xc5d   : > { %v2439_v62 = vadd.f32 %v2697_v61, %v2438_v34  ;;  %v2911_v63 = vpop.f32.mrb[1].mxu0 }
 0xc5f   : > { %v2699_v0 = vmul.f32 -1.442695, %v2439_v62 }
 0xc61   : > { %3226 = vpow2.f32 %v2699_v0 }
 0xc62   : > { %3228 = vtanh.f32 %v2439_v62 }
 0xc6b   : > { %v3227_v40 = vpop.eup %3226 }
 0xc6c   : > { %v2449_v1 = vadd.f32 1.0, %v3227_v40  ;;  %v3229_v22 = vpop.eup %3228 }
 0xc6e   : > { %3230 = vrcp.f32 %v2449_v1 }
 0xc78   : > { %v3231_v2 = vpop.eup %3230 }
 0xc79   : > { %v2452_v26 = vsel %vm2444_vm12, %v3229_v22, %v3231_v2 }
 0xc7a   : > { %2458 = vrot.lane.b32.xlu1 %v2452_v26, %s3423_s21  ;;  %v2456_v5 = vmul.f32 %v2454_v42, %v2452_v26 }
 0xcec   : > { %v2459_v32 = vpop.permute.xlu1 %2458 }
 0xced   : > { %v2461_v4 = vmul.f32 %v2459_v32, %v2452_v26 }
 0xcef   : > { %2463 = vrot.lane.b32.xlu1 %v2461_v4, %s3419_s5 }
 0xd61   : > { %v2464_v35 = vpop.permute.xlu1 %2463 }
 0xd62   : > { %v2466_v7 = vadd.f32 %v2464_v35, %v2456_v5 }
 0xd64   : > { %3232 = vtanh.f32 %v2466_v7 }
 0xd6e   : > { %v3233_v8 = vpop.eup %3232 }
 0xd6f   : > { %2469 = vrot.lane.b32.xlu0 %v3233_v8, %s3423_s21 }
 0xd73   : > { %2478 = vrot.lane.b32.xlu0 %v2328_v23, %s3423_s21 }
 0xde1   : > { %v2470_v44 = vpop.permute.xlu0 %2469 }
 0xde2   : > { %v2472_v9 = vmul.f32 %v2470_v44, %v2452_v26 }
 0xde4   : > { %2474 = vrot.lane.b32.xlu1 %v2472_v9, %s3423_s21 }
 0xde5   : > { %v2479_v11 = vpop.permute.xlu0 %2478 }
 0xde8   : > { %2482 = vrot.lane.b32.xlu1 %v2466_v7, %s3423_s21 }
 0xe56   : > { %v2475_v36 = vpop.permute.xlu1 %2474 }
 0xe57   : > { %v2485_v50 = vsel %vm1262_vm10, %v4193_v55, %v2475_v36 }
 0xe58   : > { %v2486_v39 = vsel %vm2347_vm7, %v2485_v50, %v2479_v11 }
 0xe5a   : > { %v2483_v12 = vpop.permute.xlu1 %2482 }
 0xe5b   : > { %v2487_v13 = vsel %vm2368_vm8, %v2486_v39, %v2483_v12 }
 0xe5c   : > { %2488 = vst [vmem:[%s686_s25] sm:$0xff] %v2487_v13 }
 0xe5d PF: > { %s33_s24 = sadd.s32 1, %s3388_s24   ;;  %s4340_s30 = sld [smem:[#allocation30_spill]] }
 0xe5e   : > { %p30_p0 = scmp.ge.s32.totalorder %s33_s24, 6   ;;  %s4341_s14 = sld [smem:[#allocation29_spill]] }
 0xe5f   : > { %s4342_s13 = sld [smem:[#allocation26_spill]]  ;;  %s4343_s27 = sld [smem:[#allocation27_spill]] }
 0xe60   : > { %s4344_s23 = sld [smem:[#allocation28_spill]]  ;;  %s4345_s15 = smov %s3352_s16 }
 0xe61   : > { %s4346_s16 = smov %s3356_s17  ;;  %s4348_s18 = smov %s3364_s19 }
 0xe62   : > { %s4349_s19 = smov %s3368_s20  ;;  %s4351_s21 = smov %s3380_s22 }
 0xe63   : > { %s4347_s17 = smov %s4340_s30  ;;  %32 = sbr.rel (!%p30_p0) target bundleno = 22 (0x16), region = 168 }
 0xe64   : > { %s4350_s20 = smov %s4341_s14 }
 0xe65   : > { %s4352_s22 = smov %s4343_s27 }
 0xe6a   :  { %2508 = vsyncpa [#allocation10], 1 }
 0xe6b   :  { %2510 = vsyncpa [#allocation10 + $0x1], 1 }
 0xe6c   :  { %2511 = vsyncpa [#allocation12], 1 }
 0xe6d   :  { %2513 = vsyncpa [#allocation12 + $0x1], 1 }
 0xe6e   :  { %2514 = vsyncpa [#allocation15], 1 }

</bundles_post_ra>
